<compile_context>
chip_gen: v6e
topology: v6e:2x2x1
jax: 0.10.0
libtpu: 0.0.40
codegen_flags: <defaults>
</compile_context>

<pallas_src>
import functools
import math

import jax
import jax.numpy as jnp
from jax.experimental import pallas as pl
from jax.experimental.pallas import tpu as pltpu


# ----------------------------------------------------------------------------
# small helpers traced inside the kernel (operate on VMEM-resident values)
# ----------------------------------------------------------------------------
def _layer_norm(x, w, b, eps=1e-5):
    # x: (N, D); w, b: (1, D)
    mu = jnp.mean(x, axis=-1, keepdims=True)
    xc = x - mu
    var = jnp.mean(xc * xc, axis=-1, keepdims=True)
    inv = jax.lax.rsqrt(var + eps)
    return xc * inv * w + b


def _mha(q, k, v, nhead):
    # q: (B, Tq, D); k, v: (B, Tk, D)  ->  (B, Tq, D)
    B, Tq, D = q.shape
    hd = D // nhead
    scale = 1.0 / math.sqrt(hd)
    outs = []
    for h in range(nhead):                      # static loop over heads
        lo = h * hd
        qh = q[:, :, lo:lo + hd] * scale
        kh = k[:, :, lo:lo + hd]
        vh = v[:, :, lo:lo + hd]
        s = jnp.einsum("bqd,bkd->bqk", qh, kh,
                       preferred_element_type=jnp.float32)
        s = s - jnp.max(s, axis=-1, keepdims=True)
        p = jnp.exp(s)
        p = p / jnp.sum(p, axis=-1, keepdims=True)
        outs.append(jnp.einsum("bqk,bkd->bqd", p, vh,
                               preferred_element_type=jnp.float32))
    return jnp.concatenate(outs, axis=-1)


# ----------------------------------------------------------------------------
# fused decoder kernel: one grid step == one post-norm DETR decoder layer
# ----------------------------------------------------------------------------
def _decoder_kernel(nhead, num_layers,
                    tgt_ref, mem_ref, qpos_ref, pos_ref,
                    sa_w_ref, sa_b_ref, ca_w_ref, ca_b_ref,
                    ff1_w_ref, ff1_b_ref, ff2_w_ref, ff2_b_ref,
                    nw_ref, nb_ref, fnw_ref, fnb_ref,
                    out_ref):
    l = pl.program_id(0)
    B, T, D = out_ref.shape
    S = mem_ref.shape[1]
    N = B * T

    # layer 0: initialize the carried activation from tgt
    @pl.when(l == 0)
    def _init():
        out_ref[...] = tgt_ref[...]

    x2 = out_ref[...].reshape(N, D)             # carried activation
    qp2 = qpos_ref[...].reshape(N, D)
    m2 = mem_ref[...].reshape(B * S, D)
    mp2 = pos_ref[...].reshape(B * S, D)

    def dot(a, b):
        return jnp.dot(a, b, preferred_element_type=jnp.float32)

    # ---- self-attention block -------------------------------------------
    q_in = x2 + qp2                              # with_pos_embed(tgt, query_pos)
    q = dot(q_in, sa_w_ref[0, 0]) + sa_b_ref[0, 0]
    k = dot(q_in, sa_w_ref[0, 1]) + sa_b_ref[0, 1]
    v = dot(x2, sa_w_ref[0, 2]) + sa_b_ref[0, 2]
    attn = _mha(q.reshape(B, T, D), k.reshape(B, T, D), v.reshape(B, T, D),
                nhead)
    sa_out = dot(attn.reshape(N, D), sa_w_ref[0, 3]) + sa_b_ref[0, 3]
    x2 = _layer_norm(x2 + sa_out, nw_ref[0, 0], nb_ref[0, 0])

    # ---- cross-attention block -------------------------------------------
    q = dot(x2 + qp2, ca_w_ref[0, 0]) + ca_b_ref[0, 0]
    k = dot(m2 + mp2, ca_w_ref[0, 1]) + ca_b_ref[0, 1]
    v = dot(m2, ca_w_ref[0, 2]) + ca_b_ref[0, 2]
    attn = _mha(q.reshape(B, T, D), k.reshape(B, S, D), v.reshape(B, S, D),
                nhead)
    ca_out = dot(attn.reshape(N, D), ca_w_ref[0, 3]) + ca_b_ref[0, 3]
    x2 = _layer_norm(x2 + ca_out, nw_ref[0, 1], nb_ref[0, 1])

    # ---- feed-forward block (linear -> relu -> linear) --------------------
    h = jnp.maximum(dot(x2, ff1_w_ref[0]) + ff1_b_ref[0], 0.0)
    ff = dot(h, ff2_w_ref[0]) + ff2_b_ref[0]
    x2 = _layer_norm(x2 + ff, nw_ref[0, 2], nb_ref[0, 2])

    out_ref[...] = x2.reshape(B, T, D)

    # decoder-level norm (TransformerDecoder.norm) on the final layer
    @pl.when(l == num_layers - 1)
    def _final():
        y2 = _layer_norm(x2, fnw_ref[0], fnb_ref[0])
        out_ref[...] = y2.reshape(B, T, D)


# ----------------------------------------------------------------------------
# wrapper: single pallas_call over all layers
# ----------------------------------------------------------------------------
def transformer_decoder_forward(params, tgt, memory, pos=None, query_pos=None,
                                *, nhead):
    """tgt: (T, B, D), memory: (S, B, D) in PyTorch seq-first layout."""
    T, B, D = tgt.shape
    S = memory.shape[0]
    L = int(params["sa_w"].shape[0])

    if pos is None:
        pos = jnp.zeros_like(memory)
    if query_pos is None:
        query_pos = jnp.zeros_like(tgt)

    # batch-major, feature-last layout for the kernel (lane axis = D)
    tgt_b = jnp.transpose(tgt, (1, 0, 2))
    mem_b = jnp.transpose(memory, (1, 0, 2))
    qpos_b = jnp.transpose(query_pos, (1, 0, 2))
    pos_b = jnp.transpose(pos, (1, 0, 2))

    def full_spec(shape):
        rank = len(shape)
        return pl.BlockSpec(tuple(shape), lambda l, _r=rank: (0,) * _r)

    def layer_spec(shape):
        rank = len(shape)
        return pl.BlockSpec((1,) + tuple(shape[1:]),
                            lambda l, _r=rank: (l,) + (0,) * (_r - 1))

    out_b = pl.pallas_call(
        functools.partial(_decoder_kernel, nhead, L),
        out_shape=jax.ShapeDtypeStruct((B, T, D), jnp.float32),
        grid_spec=pltpu.PrefetchScalarGridSpec(
            num_scalar_prefetch=0,
            grid=(L,),
            in_specs=[
                full_spec((B, T, D)),                 # tgt
                full_spec((B, S, D)),                 # memory
                full_spec((B, T, D)),                 # query_pos
                full_spec((B, S, D)),                 # pos
                layer_spec(params["sa_w"].shape),     # (L, 4, D, D)
                layer_spec(params["sa_b"].shape),     # (L, 4, 1, D)
                layer_spec(params["ca_w"].shape),     # (L, 4, D, D)
                layer_spec(params["ca_b"].shape),     # (L, 4, 1, D)
                layer_spec(params["ff1_w"].shape),    # (L, D, F)
                layer_spec(params["ff1_b"].shape),    # (L, 1, F)
                layer_spec(params["ff2_w"].shape),    # (L, F, D)
                layer_spec(params["ff2_b"].shape),    # (L, 1, D)
                layer_spec(params["nw"].shape),       # (L, 3, 1, D)
                layer_spec(params["nb"].shape),       # (L, 3, 1, D)
                full_spec(params["fnw"].shape),       # (1, 1, D)
                full_spec(params["fnb"].shape),       # (1, 1, D)
            ],
            out_specs=pl.BlockSpec((B, T, D), lambda l: (0, 0, 0)),
        ),
        compiler_params=pltpu.CompilerParams(
            dimension_semantics=("arbitrary",)),      # sequential layer dependency
    )(tgt_b, mem_b, qpos_b, pos_b,
      params["sa_w"], params["sa_b"], params["ca_w"], params["ca_b"],
      params["ff1_w"], params["ff1_b"], params["ff2_w"], params["ff2_b"],
      params["nw"], params["nb"], params["fnw"], params["fnb"])

    out = jnp.transpose(out_b, (1, 0, 2))             # back to (T, B, D)
    return out[None]                                  # .unsqueeze(0)


class TransformerDecoder:
    """Pallas port of the PyTorch TransformerDecoder (post-norm DETR layers,
    final LayerNorm, return_intermediate=False path)."""

    def __init__(self, params, num_layers, nhead):
        self.params = params
        self.num_layers = num_layers
        self.nhead = nhead

    def forward(self, tgt, memory, tgt_mask=None, memory_mask=None,
                tgt_key_padding_mask=None, memory_key_padding_mask=None,
                pos=None, query_pos=None):
        # TODO(synk): attention masks / key-padding masks and the
        # return_intermediate=True stacking path are not implemented (the
        # module is exercised with all masks None, matching the defaults).
        return transformer_decoder_forward(self.params, tgt, memory,
                                           pos=pos, query_pos=query_pos,
                                           nhead=self.nhead)

    __call__ = forward


# ----------------------------------------------------------------------------
# deterministic parameter construction (weights stored as (Din, Dout))
# ----------------------------------------------------------------------------
def make_decoder_params(d_model, nhead, dim_feedforward, num_layers, seed=0):
    D, F, L = d_model, dim_feedforward, num_layers
    key = jax.random.PRNGKey(seed)
    ks = jax.random.split(key, 10)

    def w_init(k, shape, fan_in):
        return jax.random.normal(k, shape, jnp.float32) / jnp.sqrt(float(fan_in))

    def b_init(k, shape):
        return 0.02 * jax.random.normal(k, shape, jnp.float32)

    params = dict(
        # attn weights stacked as [q, k, v, out_proj] along dim 1
        sa_w=w_init(ks[0], (L, 4, D, D), D),
        sa_b=b_init(ks[1], (L, 4, 1, D)),
        ca_w=w_init(ks[2], (L, 4, D, D), D),
        ca_b=b_init(ks[3], (L, 4, 1, D)),
        ff1_w=w_init(ks[4], (L, D, F), D),
        ff1_b=b_init(ks[5], (L, 1, F)),
        ff2_w=w_init(ks[6], (L, F, D), F),
        ff2_b=b_init(ks[7], (L, 1, D)),
        # per-layer norms [norm1, norm2, norm3]
        nw=jnp.ones((L, 3, 1, D), jnp.float32),
        nb=jnp.zeros((L, 3, 1, D), jnp.float32),
        # decoder-level final norm
        fnw=jnp.ones((1, 1, D), jnp.float32),
        fnb=jnp.zeros((1, 1, D), jnp.float32),
    )
    return params


# ----------------------------------------------------------------------------
# pure-JAX reference (same math, same parameter layout) for a sanity check
# ----------------------------------------------------------------------------
def _reference_decoder(params, tgt, memory, pos, query_pos, nhead):
    D = tgt.shape[-1]
    L = int(params["sa_w"].shape[0])
    hd = D // nhead
    scale = 1.0 / math.sqrt(hd)

    def ln(x, w, b, eps=1e-5):
        mu = x.mean(-1, keepdims=True)
        xc = x - mu
        var = (xc * xc).mean(-1, keepdims=True)
        return xc / jnp.sqrt(var + eps) * w + b

    def mha(q, k, v):
        outs = []
        for h in range(nhead):
            sl = slice(h * hd, (h + 1) * hd)
            s = jnp.einsum("bqd,bkd->bqk", q[..., sl] * scale, k[..., sl])
            p = jax.nn.softmax(s, axis=-1)
            outs.append(jnp.einsum("bqk,bkd->bqd", p, v[..., sl]))
        return jnp.concatenate(outs, axis=-1)

    x = jnp.transpose(tgt, (1, 0, 2))
    mem = jnp.transpose(memory, (1, 0, 2))
    qp = jnp.transpose(query_pos, (1, 0, 2))
    mp = jnp.transpose(pos, (1, 0, 2))

    for l in range(L):
        q_in = x + qp
        q = q_in @ params["sa_w"][l, 0] + params["sa_b"][l, 0]
        k = q_in @ params["sa_w"][l, 1] + params["sa_b"][l, 1]
        v = x @ params["sa_w"][l, 2] + params["sa_b"][l, 2]
        sa = mha(q, k, v) @ params["sa_w"][l, 3] + params["sa_b"][l, 3]
        x = ln(x + sa, params["nw"][l, 0], params["nb"][l, 0])

        q = (x + qp) @ params["ca_w"][l, 0] + params["ca_b"][l, 0]
        k = (mem + mp) @ params["ca_w"][l, 1] + params["ca_b"][l, 1]
        v = mem @ params["ca_w"][l, 2] + params["ca_b"][l, 2]
        ca = mha(q, k, v) @ params["ca_w"][l, 3] + params["ca_b"][l, 3]
        x = ln(x + ca, params["nw"][l, 1], params["nb"][l, 1])

        hdn = jnp.maximum(x @ params["ff1_w"][l] + params["ff1_b"][l], 0.0)
        ff = hdn @ params["ff2_w"][l] + params["ff2_b"][l]
        x = ln(x + ff, params["nw"][l, 2], params["nb"][l, 2])

    x = ln(x, params["fnw"][0], params["fnb"][0])
    return jnp.transpose(x, (1, 0, 2))[None]


if __name__ == "__main__":
    D, NHEAD, FF, L = 32, 4, 64, 2
    T, S, B = 8, 16, 2

    key = jax.random.PRNGKey(0)
    k1, k2, k3, k4 = jax.random.split(key, 4)
    tgt = jax.random.normal(k1, (T, B, D), jnp.float32)
    memory = jax.random.normal(k2, (S, B, D), jnp.float32)
    query_pos = jax.random.normal(k3, (T, B, D), jnp.float32)
    pos = jax.random.normal(k4, (S, B, D), jnp.float32)

    params = make_decoder_params(D, NHEAD, FF, L, seed=0)
    decoder = TransformerDecoder(params, num_layers=L, nhead=NHEAD)

    out = decoder(tgt, memory, pos=pos, query_pos=query_pos)
    out = jax.block_until_ready(out)

    assert out.shape == (1, T, B, D), out.shape
    assert out.dtype == jnp.float32
    assert bool(jnp.all(jnp.isfinite(out)))

    ref = _reference_decoder(params, tgt, memory, pos, query_pos, NHEAD)
    max_err = float(jnp.max(jnp.abs(out - ref)))
    assert max_err < 1e-2, f"max abs err vs reference: {max_err}"

    print("KERNEL_OK")
</pallas_src>

<mosaic_0001>
module attributes {stable_mosaic.version = 11 : i64} {
  func.func @_decoder_kernel(%arg0: i32, %arg1: memref<2x8x32xf32, #tpu.memory_space<vmem>>, %arg2: memref<2x16x32xf32, #tpu.memory_space<vmem>>, %arg3: memref<2x8x32xf32, #tpu.memory_space<vmem>>, %arg4: memref<2x16x32xf32, #tpu.memory_space<vmem>>, %arg5: memref<1x4x32x32xf32, #tpu.memory_space<vmem>>, %arg6: memref<1x4x1x32xf32, #tpu.memory_space<vmem>>, %arg7: memref<1x4x32x32xf32, #tpu.memory_space<vmem>>, %arg8: memref<1x4x1x32xf32, #tpu.memory_space<vmem>>, %arg9: memref<1x32x64xf32, #tpu.memory_space<vmem>>, %arg10: memref<1x1x64xf32, #tpu.memory_space<vmem>>, %arg11: memref<1x64x32xf32, #tpu.memory_space<vmem>>, %arg12: memref<1x1x32xf32, #tpu.memory_space<vmem>>, %arg13: memref<1x3x1x32xf32, #tpu.memory_space<vmem>>, %arg14: memref<1x3x1x32xf32, #tpu.memory_space<vmem>>, %arg15: memref<1x1x32xf32, #tpu.memory_space<vmem>>, %arg16: memref<1x1x32xf32, #tpu.memory_space<vmem>>, %arg17: memref<2x8x32xf32, #tpu.memory_space<vmem>>) attributes {dimension_semantics = [#tpu.dimension_semantics<arbitrary>], iteration_bounds = array<i64: 2>, scalar_prefetch = 0 : i64, scratch_operands = 0 : i64, tpu.core_type = #tpu.core_type<tc>, window_params = [{pipeline_mode = #tpu.pipeline_mode<synchronous>, transform_indices = @transform_0, window_bounds = array<i64: 2, 8, 32>}, {pipeline_mode = #tpu.pipeline_mode<synchronous>, transform_indices = @transform_1, window_bounds = array<i64: 2, 16, 32>}, {pipeline_mode = #tpu.pipeline_mode<synchronous>, transform_indices = @transform_2, window_bounds = array<i64: 2, 8, 32>}, {pipeline_mode = #tpu.pipeline_mode<synchronous>, transform_indices = @transform_3, window_bounds = array<i64: 2, 16, 32>}, {transform_indices = @transform_4, window_bounds = array<i64: 1, 4, 32, 32>}, {transform_indices = @transform_5, window_bounds = array<i64: 1, 4, 1, 32>}, {transform_indices = @transform_6, window_bounds = array<i64: 1, 4, 32, 32>}, {transform_indices = @transform_7, window_bounds = array<i64: 1, 4, 1, 32>}, {transform_indices = @transform_8, window_bounds = array<i64: 1, 32, 64>}, {transform_indices = @transform_9, window_bounds = array<i64: 1, 1, 64>}, {transform_indices = @transform_10, window_bounds = array<i64: 1, 64, 32>}, {transform_indices = @transform_11, window_bounds = array<i64: 1, 1, 32>}, {transform_indices = @transform_12, window_bounds = array<i64: 1, 3, 1, 32>}, {transform_indices = @transform_13, window_bounds = array<i64: 1, 3, 1, 32>}, {pipeline_mode = #tpu.pipeline_mode<synchronous>, transform_indices = @transform_14, window_bounds = array<i64: 1, 1, 32>}, {pipeline_mode = #tpu.pipeline_mode<synchronous>, transform_indices = @transform_15, window_bounds = array<i64: 1, 1, 32>}, {pipeline_mode = #tpu.pipeline_mode<synchronous>, transform_indices = @transform_16, window_bounds = array<i64: 2, 8, 32>}]} {
    %c0_i32 = arith.constant 0 : i32
    %0 = arith.cmpi eq, %arg0, %c0_i32 : i32
    %1 = arith.extui %0 : i1 to i32
    %c0_i32_0 = arith.constant 0 : i32
    %2 = arith.cmpi ne, %1, %c0_i32_0 : i32
    scf.if %2 {
      %c0_178 = arith.constant 0 : index
      %c0_179 = arith.constant 0 : index
      %c0_180 = arith.constant 0 : index
      %304 = vector.load %arg1[%c0_178, %c0_179, %c0_180] : memref<2x8x32xf32, #tpu.memory_space<vmem>>, vector<2x8x32xf32>
      %c0_181 = arith.constant 0 : index
      %c0_182 = arith.constant 0 : index
      %c0_183 = arith.constant 0 : index
      %305 = vector.load %arg17[%c0_181, %c0_182, %c0_183] : memref<2x8x32xf32, #tpu.memory_space<vmem>>, vector<2x8x32xf32>
      tpu.vector_store %arg17[%c0_181, %c0_182, %c0_183], %304 {strides = array<i32>} : memref<2x8x32xf32, #tpu.memory_space<vmem>>, vector<2x8x32xf32>,
    } else {
    }
    %c0 = arith.constant 0 : index
    %c0_1 = arith.constant 0 : index
    %c0_2 = arith.constant 0 : index
    %3 = vector.load %arg17[%c0, %c0_1, %c0_2] : memref<2x8x32xf32, #tpu.memory_space<vmem>>, vector<2x8x32xf32>
    %4 = vector.shape_cast %3 : vector<2x8x32xf32> to vector<16x32xf32>
    %c0_3 = arith.constant 0 : index
    %c0_4 = arith.constant 0 : index
    %c0_5 = arith.constant 0 : index
    %5 = vector.load %arg3[%c0_3, %c0_4, %c0_5] : memref<2x8x32xf32, #tpu.memory_space<vmem>>, vector<2x8x32xf32>
    %6 = vector.shape_cast %5 : vector<2x8x32xf32> to vector<16x32xf32>
    %c0_6 = arith.constant 0 : index
    %c0_7 = arith.constant 0 : index
    %c0_8 = arith.constant 0 : index
    %7 = vector.load %arg2[%c0_6, %c0_7, %c0_8] : memref<2x16x32xf32, #tpu.memory_space<vmem>>, vector<2x16x32xf32>
    %8 = vector.shape_cast %7 : vector<2x16x32xf32> to vector<32x32xf32>
    %c0_9 = arith.constant 0 : index
    %c0_10 = arith.constant 0 : index
    %c0_11 = arith.constant 0 : index
    %9 = vector.load %arg4[%c0_9, %c0_10, %c0_11] : memref<2x16x32xf32, #tpu.memory_space<vmem>>, vector<2x16x32xf32>
    %10 = vector.shape_cast %9 : vector<2x16x32xf32> to vector<32x32xf32>
    %11 = arith.addf %4, %6 : vector<16x32xf32>
    %c0_12 = arith.constant 0 : index
    %c0_13 = arith.constant 0 : index
    %c0_14 = arith.constant 0 : index
    %c0_15 = arith.constant 0 : index
    %12 = vector.load %arg5[%c0_12, %c0_13, %c0_14, %c0_15] : memref<1x4x32x32xf32, #tpu.memory_space<vmem>>, vector<1x1x32x32xf32>
    %13 = vector.shape_cast %12 : vector<1x1x32x32xf32> to vector<32x32xf32>
    %cst = arith.constant dense<0.000000e+00> : vector<16x32xf32>
    %14 = tpu.matmul %11, %13, %cst {dimension_numbers = #tpu.dot_dimension_numbers<[1], [0], [0], [1], [0, 0, 1, 1], [], []>} : vector<16x32xf32>, vector<32x32xf32>, vector<16x32xf32> -> vector<16x32xf32>
    %c0_16 = arith.constant 0 : index
    %c0_17 = arith.constant 0 : index
    %c0_18 = arith.constant 0 : index
    %c0_19 = arith.constant 0 : index
    %15 = vector.load %arg6[%c0_16, %c0_17, %c0_18, %c0_19] : memref<1x4x1x32xf32, #tpu.memory_space<vmem>>, vector<1x1x1x32xf32>
    %16 = vector.shape_cast %15 : vector<1x1x1x32xf32> to vector<1x32xf32>
    %17 = vector.broadcast %16 : vector<1x32xf32> to vector<16x32xf32>
    %18 = arith.addf %14, %17 : vector<16x32xf32>
    %c0_20 = arith.constant 0 : index
    %c1 = arith.constant 1 : index
    %c0_21 = arith.constant 0 : index
    %c0_22 = arith.constant 0 : index
    %19 = vector.load %arg5[%c0_20, %c1, %c0_21, %c0_22] : memref<1x4x32x32xf32, #tpu.memory_space<vmem>>, vector<1x1x32x32xf32>
    %20 = vector.shape_cast %19 : vector<1x1x32x32xf32> to vector<32x32xf32>
    %cst_23 = arith.constant dense<0.000000e+00> : vector<16x32xf32>
    %21 = tpu.matmul %11, %20, %cst_23 {dimension_numbers = #tpu.dot_dimension_numbers<[1], [0], [0], [1], [0, 0, 1, 1], [], []>} : vector<16x32xf32>, vector<32x32xf32>, vector<16x32xf32> -> vector<16x32xf32>
    %c0_24 = arith.constant 0 : index
    %c1_25 = arith.constant 1 : index
    %c0_26 = arith.constant 0 : index
    %c0_27 = arith.constant 0 : index
    %22 = vector.load %arg6[%c0_24, %c1_25, %c0_26, %c0_27] : memref<1x4x1x32xf32, #tpu.memory_space<vmem>>, vector<1x1x1x32xf32>
    %23 = vector.shape_cast %22 : vector<1x1x1x32xf32> to vector<1x32xf32>
    %24 = vector.broadcast %23 : vector<1x32xf32> to vector<16x32xf32>
    %25 = arith.addf %21, %24 : vector<16x32xf32>
    %c0_28 = arith.constant 0 : index
    %c2 = arith.constant 2 : index
    %c0_29 = arith.constant 0 : index
    %c0_30 = arith.constant 0 : index
    %26 = vector.load %arg5[%c0_28, %c2, %c0_29, %c0_30] : memref<1x4x32x32xf32, #tpu.memory_space<vmem>>, vector<1x1x32x32xf32>
    %27 = vector.shape_cast %26 : vector<1x1x32x32xf32> to vector<32x32xf32>
    %cst_31 = arith.constant dense<0.000000e+00> : vector<16x32xf32>
    %28 = tpu.matmul %4, %27, %cst_31 {dimension_numbers = #tpu.dot_dimension_numbers<[1], [0], [0], [1], [0, 0, 1, 1], [], []>} : vector<16x32xf32>, vector<32x32xf32>, vector<16x32xf32> -> vector<16x32xf32>
    %c0_32 = arith.constant 0 : index
    %c2_33 = arith.constant 2 : index
    %c0_34 = arith.constant 0 : index
    %c0_35 = arith.constant 0 : index
    %29 = vector.load %arg6[%c0_32, %c2_33, %c0_34, %c0_35] : memref<1x4x1x32xf32, #tpu.memory_space<vmem>>, vector<1x1x1x32xf32>
    %30 = vector.shape_cast %29 : vector<1x1x1x32xf32> to vector<1x32xf32>
    %31 = vector.broadcast %30 : vector<1x32xf32> to vector<16x32xf32>
    %32 = arith.addf %28, %31 : vector<16x32xf32>
    %33 = vector.shape_cast %18 : vector<16x32xf32> to vector<2x8x32xf32>
    %34 = vector.shape_cast %25 : vector<16x32xf32> to vector<2x8x32xf32>
    %35 = vector.shape_cast %32 : vector<16x32xf32> to vector<2x8x32xf32>
    %36 = vector.extract_strided_slice %33 {offsets = [0, 0, 0], sizes = [2, 8, 8], strides = [1, 1, 1]} : vector<2x8x32xf32> to vector<2x8x8xf32>
    %cst_36 = arith.constant 0.353553385 : f32
    %37 = vector.broadcast %cst_36 : f32 to vector<2x8x8xf32>
    %38 = arith.mulf %36, %37 : vector<2x8x8xf32>
    %39 = vector.extract_strided_slice %34 {offsets = [0, 0, 0], sizes = [2, 8, 8], strides = [1, 1, 1]} : vector<2x8x32xf32> to vector<2x8x8xf32>
    %40 = vector.extract_strided_slice %35 {offsets = [0, 0, 0], sizes = [2, 8, 8], strides = [1, 1, 1]} : vector<2x8x32xf32> to vector<2x8x8xf32>
    "tpu.trace_start"() <{level = 10 : i32, message = "bqd,bkd->bqk"}> : () -> ()
    %cst_37 = arith.constant dense<0.000000e+00> : vector<2x8x8xf32>
    %41 = tpu.matmul %38, %39, %cst_37 {dimension_numbers = #tpu.dot_dimension_numbers<[2], [2], [1], [1], [0, 0, 0, 1, 1, 1], [0], [0]>} : vector<2x8x8xf32>, vector<2x8x8xf32>, vector<2x8x8xf32> -> vector<2x8x8xf32>
    "tpu.trace_stop"() : () -> ()
    %cst_38 = arith.constant dense<0xFF800000> : vector<2x8xf32>
    %42 = vector.multi_reduction <maximumf>, %41, %cst_38 [2] : vector<2x8x8xf32> to vector<2x8xf32>
    %43 = vector.shape_cast %42 : vector<2x8xf32> to vector<2x8x1xf32>
    %44 = vector.broadcast %43 : vector<2x8x1xf32> to vector<2x8x8xf32>
    %45 = arith.subf %41, %44 : vector<2x8x8xf32>
    %46 = math.exp %45 : vector<2x8x8xf32>
    %cst_39 = arith.constant dense<0.000000e+00> : vector<2x8xf32>
    %47 = vector.multi_reduction <add>, %46, %cst_39 [2] : vector<2x8x8xf32> to vector<2x8xf32>
    %48 = vector.shape_cast %47 : vector<2x8xf32> to vector<2x8x1xf32>
    %49 = vector.broadcast %48 : vector<2x8x1xf32> to vector<2x8x8xf32>
    %50 = arith.divf %46, %49 : vector<2x8x8xf32>
    "tpu.trace_start"() <{level = 10 : i32, message = "bqk,bkd->bqd"}> : () -> ()
    %cst_40 = arith.constant dense<0.000000e+00> : vector<2x8x8xf32>
    %51 = tpu.matmul %50, %40, %cst_40 {dimension_numbers = #tpu.dot_dimension_numbers<[2], [1], [1], [2], [0, 0, 0, 1, 1, 2], [0], [0]>} : vector<2x8x8xf32>, vector<2x8x8xf32>, vector<2x8x8xf32> -> vector<2x8x8xf32>
    "tpu.trace_stop"() : () -> ()
    %52 = vector.extract_strided_slice %33 {offsets = [0, 0, 8], sizes = [2, 8, 8], strides = [1, 1, 1]} : vector<2x8x32xf32> to vector<2x8x8xf32>
    %cst_41 = arith.constant 0.353553385 : f32
    %53 = vector.broadcast %cst_41 : f32 to vector<2x8x8xf32>
    %54 = arith.mulf %52, %53 : vector<2x8x8xf32>
    %55 = vector.extract_strided_slice %34 {offsets = [0, 0, 8], sizes = [2, 8, 8], strides = [1, 1, 1]} : vector<2x8x32xf32> to vector<2x8x8xf32>
    %56 = vector.extract_strided_slice %35 {offsets = [0, 0, 8], sizes = [2, 8, 8], strides = [1, 1, 1]} : vector<2x8x32xf32> to vector<2x8x8xf32>
    "tpu.trace_start"() <{level = 10 : i32, message = "bqd,bkd->bqk"}> : () -> ()
    %cst_42 = arith.constant dense<0.000000e+00> : vector<2x8x8xf32>
    %57 = tpu.matmul %54, %55, %cst_42 {dimension_numbers = #tpu.dot_dimension_numbers<[2], [2], [1], [1], [0, 0, 0, 1, 1, 1], [0], [0]>} : vector<2x8x8xf32>, vector<2x8x8xf32>, vector<2x8x8xf32> -> vector<2x8x8xf32>
    "tpu.trace_stop"() : () -> ()
    %cst_43 = arith.constant dense<0xFF800000> : vector<2x8xf32>
    %58 = vector.multi_reduction <maximumf>, %57, %cst_43 [2] : vector<2x8x8xf32> to vector<2x8xf32>
    %59 = vector.shape_cast %58 : vector<2x8xf32> to vector<2x8x1xf32>
    %60 = vector.broadcast %59 : vector<2x8x1xf32> to vector<2x8x8xf32>
    %61 = arith.subf %57, %60 : vector<2x8x8xf32>
    %62 = math.exp %61 : vector<2x8x8xf32>
    %cst_44 = arith.constant dense<0.000000e+00> : vector<2x8xf32>
    %63 = vector.multi_reduction <add>, %62, %cst_44 [2] : vector<2x8x8xf32> to vector<2x8xf32>
    %64 = vector.shape_cast %63 : vector<2x8xf32> to vector<2x8x1xf32>
    %65 = vector.broadcast %64 : vector<2x8x1xf32> to vector<2x8x8xf32>
    %66 = arith.divf %62, %65 : vector<2x8x8xf32>
    "tpu.trace_start"() <{level = 10 : i32, message = "bqk,bkd->bqd"}> : () -> ()
    %cst_45 = arith.constant dense<0.000000e+00> : vector<2x8x8xf32>
    %67 = tpu.matmul %66, %56, %cst_45 {dimension_numbers = #tpu.dot_dimension_numbers<[2], [1], [1], [2], [0, 0, 0, 1, 1, 2], [0], [0]>} : vector<2x8x8xf32>, vector<2x8x8xf32>, vector<2x8x8xf32> -> vector<2x8x8xf32>
    "tpu.trace_stop"() : () -> ()
    %68 = vector.extract_strided_slice %33 {offsets = [0, 0, 16], sizes = [2, 8, 8], strides = [1, 1, 1]} : vector<2x8x32xf32> to vector<2x8x8xf32>
    %cst_46 = arith.constant 0.353553385 : f32
    %69 = vector.broadcast %cst_46 : f32 to vector<2x8x8xf32>
    %70 = arith.mulf %68, %69 : vector<2x8x8xf32>
    %71 = vector.extract_strided_slice %34 {offsets = [0, 0, 16], sizes = [2, 8, 8], strides = [1, 1, 1]} : vector<2x8x32xf32> to vector<2x8x8xf32>
    %72 = vector.extract_strided_slice %35 {offsets = [0, 0, 16], sizes = [2, 8, 8], strides = [1, 1, 1]} : vector<2x8x32xf32> to vector<2x8x8xf32>
    "tpu.trace_start"() <{level = 10 : i32, message = "bqd,bkd->bqk"}> : () -> ()
    %cst_47 = arith.constant dense<0.000000e+00> : vector<2x8x8xf32>
    %73 = tpu.matmul %70, %71, %cst_47 {dimension_numbers = #tpu.dot_dimension_numbers<[2], [2], [1], [1], [0, 0, 0, 1, 1, 1], [0], [0]>} : vector<2x8x8xf32>, vector<2x8x8xf32>, vector<2x8x8xf32> -> vector<2x8x8xf32>
    "tpu.trace_stop"() : () -> ()
    %cst_48 = arith.constant dense<0xFF800000> : vector<2x8xf32>
    %74 = vector.multi_reduction <maximumf>, %73, %cst_48 [2] : vector<2x8x8xf32> to vector<2x8xf32>
    %75 = vector.shape_cast %74 : vector<2x8xf32> to vector<2x8x1xf32>
    %76 = vector.broadcast %75 : vector<2x8x1xf32> to vector<2x8x8xf32>
    %77 = arith.subf %73, %76 : vector<2x8x8xf32>
    %78 = math.exp %77 : vector<2x8x8xf32>
    %cst_49 = arith.constant dense<0.000000e+00> : vector<2x8xf32>
    %79 = vector.multi_reduction <add>, %78, %cst_49 [2] : vector<2x8x8xf32> to vector<2x8xf32>
    %80 = vector.shape_cast %79 : vector<2x8xf32> to vector<2x8x1xf32>
    %81 = vector.broadcast %80 : vector<2x8x1xf32> to vector<2x8x8xf32>
    %82 = arith.divf %78, %81 : vector<2x8x8xf32>
    "tpu.trace_start"() <{level = 10 : i32, message = "bqk,bkd->bqd"}> : () -> ()
    %cst_50 = arith.constant dense<0.000000e+00> : vector<2x8x8xf32>
    %83 = tpu.matmul %82, %72, %cst_50 {dimension_numbers = #tpu.dot_dimension_numbers<[2], [1], [1], [2], [0, 0, 0, 1, 1, 2], [0], [0]>} : vector<2x8x8xf32>, vector<2x8x8xf32>, vector<2x8x8xf32> -> vector<2x8x8xf32>
    "tpu.trace_stop"() : () -> ()
    %84 = vector.extract_strided_slice %33 {offsets = [0, 0, 24], sizes = [2, 8, 8], strides = [1, 1, 1]} : vector<2x8x32xf32> to vector<2x8x8xf32>
    %cst_51 = arith.constant 0.353553385 : f32
    %85 = vector.broadcast %cst_51 : f32 to vector<2x8x8xf32>
    %86 = arith.mulf %84, %85 : vector<2x8x8xf32>
    %87 = vector.extract_strided_slice %34 {offsets = [0, 0, 24], sizes = [2, 8, 8], strides = [1, 1, 1]} : vector<2x8x32xf32> to vector<2x8x8xf32>
    %88 = vector.extract_strided_slice %35 {offsets = [0, 0, 24], sizes = [2, 8, 8], strides = [1, 1, 1]} : vector<2x8x32xf32> to vector<2x8x8xf32>
    "tpu.trace_start"() <{level = 10 : i32, message = "bqd,bkd->bqk"}> : () -> ()
    %cst_52 = arith.constant dense<0.000000e+00> : vector<2x8x8xf32>
    %89 = tpu.matmul %86, %87, %cst_52 {dimension_numbers = #tpu.dot_dimension_numbers<[2], [2], [1], [1], [0, 0, 0, 1, 1, 1], [0], [0]>} : vector<2x8x8xf32>, vector<2x8x8xf32>, vector<2x8x8xf32> -> vector<2x8x8xf32>
    "tpu.trace_stop"() : () -> ()
    %cst_53 = arith.constant dense<0xFF800000> : vector<2x8xf32>
    %90 = vector.multi_reduction <maximumf>, %89, %cst_53 [2] : vector<2x8x8xf32> to vector<2x8xf32>
    %91 = vector.shape_cast %90 : vector<2x8xf32> to vector<2x8x1xf32>
    %92 = vector.broadcast %91 : vector<2x8x1xf32> to vector<2x8x8xf32>
    %93 = arith.subf %89, %92 : vector<2x8x8xf32>
    %94 = math.exp %93 : vector<2x8x8xf32>
    %cst_54 = arith.constant dense<0.000000e+00> : vector<2x8xf32>
    %95 = vector.multi_reduction <add>, %94, %cst_54 [2] : vector<2x8x8xf32> to vector<2x8xf32>
    %96 = vector.shape_cast %95 : vector<2x8xf32> to vector<2x8x1xf32>
    %97 = vector.broadcast %96 : vector<2x8x1xf32> to vector<2x8x8xf32>
    %98 = arith.divf %94, %97 : vector<2x8x8xf32>
    "tpu.trace_start"() <{level = 10 : i32, message = "bqk,bkd->bqd"}> : () -> ()
    %cst_55 = arith.constant dense<0.000000e+00> : vector<2x8x8xf32>
    %99 = tpu.matmul %98, %88, %cst_55 {dimension_numbers = #tpu.dot_dimension_numbers<[2], [1], [1], [2], [0, 0, 0, 1, 1, 2], [0], [0]>} : vector<2x8x8xf32>, vector<2x8x8xf32>, vector<2x8x8xf32> -> vector<2x8x8xf32>
    "tpu.trace_stop"() : () -> ()
    %100 = tpu.concatenate %51, %67, %83, %99 in 2 : vector<2x8x8xf32>, vector<2x8x8xf32>, vector<2x8x8xf32>, vector<2x8x8xf32> -> vector<2x8x32xf32>
    %101 = vector.shape_cast %100 : vector<2x8x32xf32> to vector<16x32xf32>
    %c0_56 = arith.constant 0 : index
    %c3 = arith.constant 3 : index
    %c0_57 = arith.constant 0 : index
    %c0_58 = arith.constant 0 : index
    %102 = vector.load %arg5[%c0_56, %c3, %c0_57, %c0_58] : memref<1x4x32x32xf32, #tpu.memory_space<vmem>>, vector<1x1x32x32xf32>
    %103 = vector.shape_cast %102 : vector<1x1x32x32xf32> to vector<32x32xf32>
    %cst_59 = arith.constant dense<0.000000e+00> : vector<16x32xf32>
    %104 = tpu.matmul %101, %103, %cst_59 {dimension_numbers = #tpu.dot_dimension_numbers<[1], [0], [0], [1], [0, 0, 1, 1], [], []>} : vector<16x32xf32>, vector<32x32xf32>, vector<16x32xf32> -> vector<16x32xf32>
    %c0_60 = arith.constant 0 : index
    %c3_61 = arith.constant 3 : index
    %c0_62 = arith.constant 0 : index
    %c0_63 = arith.constant 0 : index
    %105 = vector.load %arg6[%c0_60, %c3_61, %c0_62, %c0_63] : memref<1x4x1x32xf32, #tpu.memory_space<vmem>>, vector<1x1x1x32xf32>
    %106 = vector.shape_cast %105 : vector<1x1x1x32xf32> to vector<1x32xf32>
    %107 = vector.broadcast %106 : vector<1x32xf32> to vector<16x32xf32>
    %108 = arith.addf %104, %107 : vector<16x32xf32>
    %109 = arith.addf %4, %108 : vector<16x32xf32>
    %c0_64 = arith.constant 0 : index
    %c0_65 = arith.constant 0 : index
    %c0_66 = arith.constant 0 : index
    %c0_67 = arith.constant 0 : index
    %110 = vector.load %arg13[%c0_64, %c0_65, %c0_66, %c0_67] : memref<1x3x1x32xf32, #tpu.memory_space<vmem>>, vector<1x1x1x32xf32>
    %111 = vector.shape_cast %110 : vector<1x1x1x32xf32> to vector<1x32xf32>
    %c0_68 = arith.constant 0 : index
    %c0_69 = arith.constant 0 : index
    %c0_70 = arith.constant 0 : index
    %c0_71 = arith.constant 0 : index
    %112 = vector.load %arg14[%c0_68, %c0_69, %c0_70, %c0_71] : memref<1x3x1x32xf32, #tpu.memory_space<vmem>>, vector<1x1x1x32xf32>
    %113 = vector.shape_cast %112 : vector<1x1x1x32xf32> to vector<1x32xf32>
    %cst_72 = arith.constant dense<0.000000e+00> : vector<16xf32>
    %114 = vector.multi_reduction <add>, %109, %cst_72 [1] : vector<16x32xf32> to vector<16xf32>
    %115 = vector.shape_cast %114 : vector<16xf32> to vector<16x1xf32>
    %cst_73 = arith.constant 3.200000e+01 : f32
    %116 = vector.broadcast %cst_73 : f32 to vector<16x1xf32>
    %117 = arith.divf %115, %116 : vector<16x1xf32>
    %118 = vector.broadcast %117 : vector<16x1xf32> to vector<16x32xf32>
    %119 = arith.subf %109, %118 : vector<16x32xf32>
    %120 = arith.mulf %119, %119 : vector<16x32xf32>
    %cst_74 = arith.constant dense<0.000000e+00> : vector<16xf32>
    %121 = vector.multi_reduction <add>, %120, %cst_74 [1] : vector<16x32xf32> to vector<16xf32>
    %122 = vector.shape_cast %121 : vector<16xf32> to vector<16x1xf32>
    %cst_75 = arith.constant 3.200000e+01 : f32
    %123 = vector.broadcast %cst_75 : f32 to vector<16x1xf32>
    %124 = arith.divf %122, %123 : vector<16x1xf32>
    %cst_76 = arith.constant 9.99999974E-6 : f32
    %125 = vector.broadcast %cst_76 : f32 to vector<16x1xf32>
    %126 = arith.addf %124, %125 : vector<16x1xf32>
    %127 = math.rsqrt %126 : vector<16x1xf32>
    %128 = vector.broadcast %127 : vector<16x1xf32> to vector<16x32xf32>
    %129 = arith.mulf %119, %128 : vector<16x32xf32>
    %130 = vector.broadcast %111 : vector<1x32xf32> to vector<16x32xf32>
    %131 = arith.mulf %129, %130 : vector<16x32xf32>
    %132 = vector.broadcast %113 : vector<1x32xf32> to vector<16x32xf32>
    %133 = arith.addf %131, %132 : vector<16x32xf32>
    %134 = arith.addf %133, %6 : vector<16x32xf32>
    %c0_77 = arith.constant 0 : index
    %c0_78 = arith.constant 0 : index
    %c0_79 = arith.constant 0 : index
    %c0_80 = arith.constant 0 : index
    %135 = vector.load %arg7[%c0_77, %c0_78, %c0_79, %c0_80] : memref<1x4x32x32xf32, #tpu.memory_space<vmem>>, vector<1x1x32x32xf32>
    %136 = vector.shape_cast %135 : vector<1x1x32x32xf32> to vector<32x32xf32>
    %cst_81 = arith.constant dense<0.000000e+00> : vector<16x32xf32>
    %137 = tpu.matmul %134, %136, %cst_81 {dimension_numbers = #tpu.dot_dimension_numbers<[1], [0], [0], [1], [0, 0, 1, 1], [], []>} : vector<16x32xf32>, vector<32x32xf32>, vector<16x32xf32> -> vector<16x32xf32>
    %c0_82 = arith.constant 0 : index
    %c0_83 = arith.constant 0 : index
    %c0_84 = arith.constant 0 : index
    %c0_85 = arith.constant 0 : index
    %138 = vector.load %arg8[%c0_82, %c0_83, %c0_84, %c0_85] : memref<1x4x1x32xf32, #tpu.memory_space<vmem>>, vector<1x1x1x32xf32>
    %139 = vector.shape_cast %138 : vector<1x1x1x32xf32> to vector<1x32xf32>
    %140 = vector.broadcast %139 : vector<1x32xf32> to vector<16x32xf32>
    %141 = arith.addf %137, %140 : vector<16x32xf32>
    %142 = arith.addf %8, %10 : vector<32x32xf32>
    %c0_86 = arith.constant 0 : index
    %c1_87 = arith.constant 1 : index
    %c0_88 = arith.constant 0 : index
    %c0_89 = arith.constant 0 : index
    %143 = vector.load %arg7[%c0_86, %c1_87, %c0_88, %c0_89] : memref<1x4x32x32xf32, #tpu.memory_space<vmem>>, vector<1x1x32x32xf32>
    %144 = vector.shape_cast %143 : vector<1x1x32x32xf32> to vector<32x32xf32>
    %cst_90 = arith.constant dense<0.000000e+00> : vector<32x32xf32>
    %145 = tpu.matmul %142, %144, %cst_90 {dimension_numbers = #tpu.dot_dimension_numbers<[1], [0], [0], [1], [0, 0, 1, 1], [], []>} : vector<32x32xf32>, vector<32x32xf32>, vector<32x32xf32> -> vector<32x32xf32>
    %c0_91 = arith.constant 0 : index
    %c1_92 = arith.constant 1 : index
    %c0_93 = arith.constant 0 : index
    %c0_94 = arith.constant 0 : index
    %146 = vector.load %arg8[%c0_91, %c1_92, %c0_93, %c0_94] : memref<1x4x1x32xf32, #tpu.memory_space<vmem>>, vector<1x1x1x32xf32>
    %147 = vector.shape_cast %146 : vector<1x1x1x32xf32> to vector<1x32xf32>
    %148 = vector.broadcast %147 : vector<1x32xf32> to vector<32x32xf32>
    %149 = arith.addf %145, %148 : vector<32x32xf32>
    %c0_95 = arith.constant 0 : index
    %c2_96 = arith.constant 2 : index
    %c0_97 = arith.constant 0 : index
    %c0_98 = arith.constant 0 : index
    %150 = vector.load %arg7[%c0_95, %c2_96, %c0_97, %c0_98] : memref<1x4x32x32xf32, #tpu.memory_space<vmem>>, vector<1x1x32x32xf32>
    %151 = vector.shape_cast %150 : vector<1x1x32x32xf32> to vector<32x32xf32>
    %cst_99 = arith.constant dense<0.000000e+00> : vector<32x32xf32>
    %152 = tpu.matmul %8, %151, %cst_99 {dimension_numbers = #tpu.dot_dimension_numbers<[1], [0], [0], [1], [0, 0, 1, 1], [], []>} : vector<32x32xf32>, vector<32x32xf32>, vector<32x32xf32> -> vector<32x32xf32>
    %c0_100 = arith.constant 0 : index
    %c2_101 = arith.constant 2 : index
    %c0_102 = arith.constant 0 : index
    %c0_103 = arith.constant 0 : index
    %153 = vector.load %arg8[%c0_100, %c2_101, %c0_102, %c0_103] : memref<1x4x1x32xf32, #tpu.memory_space<vmem>>, vector<1x1x1x32xf32>
    %154 = vector.shape_cast %153 : vector<1x1x1x32xf32> to vector<1x32xf32>
    %155 = vector.broadcast %154 : vector<1x32xf32> to vector<32x32xf32>
    %156 = arith.addf %152, %155 : vector<32x32xf32>
    %157 = vector.shape_cast %141 : vector<16x32xf32> to vector<2x8x32xf32>
    %158 = vector.shape_cast %149 : vector<32x32xf32> to vector<2x16x32xf32>
    %159 = vector.shape_cast %156 : vector<32x32xf32> to vector<2x16x32xf32>
    %160 = vector.extract_strided_slice %157 {offsets = [0, 0, 0], sizes = [2, 8, 8], strides = [1, 1, 1]} : vector<2x8x32xf32> to vector<2x8x8xf32>
    %cst_104 = arith.constant 0.353553385 : f32
    %161 = vector.broadcast %cst_104 : f32 to vector<2x8x8xf32>
    %162 = arith.mulf %160, %161 : vector<2x8x8xf32>
    %163 = vector.extract_strided_slice %158 {offsets = [0, 0, 0], sizes = [2, 16, 8], strides = [1, 1, 1]} : vector<2x16x32xf32> to vector<2x16x8xf32>
    %164 = vector.extract_strided_slice %159 {offsets = [0, 0, 0], sizes = [2, 16, 8], strides = [1, 1, 1]} : vector<2x16x32xf32> to vector<2x16x8xf32>
    "tpu.trace_start"() <{level = 10 : i32, message = "bqd,bkd->bqk"}> : () -> ()
    %cst_105 = arith.constant dense<0.000000e+00> : vector<2x8x16xf32>
    %165 = tpu.matmul %162, %163, %cst_105 {dimension_numbers = #tpu.dot_dimension_numbers<[2], [2], [1], [1], [0, 0, 0, 1, 1, 1], [0], [0]>} : vector<2x8x8xf32>, vector<2x16x8xf32>, vector<2x8x16xf32> -> vector<2x8x16xf32>
    "tpu.trace_stop"() : () -> ()
    %cst_106 = arith.constant dense<0xFF800000> : vector<2x8xf32>
    %166 = vector.multi_reduction <maximumf>, %165, %cst_106 [2] : vector<2x8x16xf32> to vector<2x8xf32>
    %167 = vector.shape_cast %166 : vector<2x8xf32> to vector<2x8x1xf32>
    %168 = vector.broadcast %167 : vector<2x8x1xf32> to vector<2x8x16xf32>
    %169 = arith.subf %165, %168 : vector<2x8x16xf32>
    %170 = math.exp %169 : vector<2x8x16xf32>
    %cst_107 = arith.constant dense<0.000000e+00> : vector<2x8xf32>
    %171 = vector.multi_reduction <add>, %170, %cst_107 [2] : vector<2x8x16xf32> to vector<2x8xf32>
    %172 = vector.shape_cast %171 : vector<2x8xf32> to vector<2x8x1xf32>
    %173 = vector.broadcast %172 : vector<2x8x1xf32> to vector<2x8x16xf32>
    %174 = arith.divf %170, %173 : vector<2x8x16xf32>
    "tpu.trace_start"() <{level = 10 : i32, message = "bqk,bkd->bqd"}> : () -> ()
    %cst_108 = arith.constant dense<0.000000e+00> : vector<2x8x8xf32>
    %175 = tpu.matmul %174, %164, %cst_108 {dimension_numbers = #tpu.dot_dimension_numbers<[2], [1], [1], [2], [0, 0, 0, 1, 1, 2], [0], [0]>} : vector<2x8x16xf32>, vector<2x16x8xf32>, vector<2x8x8xf32> -> vector<2x8x8xf32>
    "tpu.trace_stop"() : () -> ()
    %176 = vector.extract_strided_slice %157 {offsets = [0, 0, 8], sizes = [2, 8, 8], strides = [1, 1, 1]} : vector<2x8x32xf32> to vector<2x8x8xf32>
    %cst_109 = arith.constant 0.353553385 : f32
    %177 = vector.broadcast %cst_109 : f32 to vector<2x8x8xf32>
    %178 = arith.mulf %176, %177 : vector<2x8x8xf32>
    %179 = vector.extract_strided_slice %158 {offsets = [0, 0, 8], sizes = [2, 16, 8], strides = [1, 1, 1]} : vector<2x16x32xf32> to vector<2x16x8xf32>
    %180 = vector.extract_strided_slice %159 {offsets = [0, 0, 8], sizes = [2, 16, 8], strides = [1, 1, 1]} : vector<2x16x32xf32> to vector<2x16x8xf32>
    "tpu.trace_start"() <{level = 10 : i32, message = "bqd,bkd->bqk"}> : () -> ()
    %cst_110 = arith.constant dense<0.000000e+00> : vector<2x8x16xf32>
    %181 = tpu.matmul %178, %179, %cst_110 {dimension_numbers = #tpu.dot_dimension_numbers<[2], [2], [1], [1], [0, 0, 0, 1, 1, 1], [0], [0]>} : vector<2x8x8xf32>, vector<2x16x8xf32>, vector<2x8x16xf32> -> vector<2x8x16xf32>
    "tpu.trace_stop"() : () -> ()
    %cst_111 = arith.constant dense<0xFF800000> : vector<2x8xf32>
    %182 = vector.multi_reduction <maximumf>, %181, %cst_111 [2] : vector<2x8x16xf32> to vector<2x8xf32>
    %183 = vector.shape_cast %182 : vector<2x8xf32> to vector<2x8x1xf32>
    %184 = vector.broadcast %183 : vector<2x8x1xf32> to vector<2x8x16xf32>
    %185 = arith.subf %181, %184 : vector<2x8x16xf32>
    %186 = math.exp %185 : vector<2x8x16xf32>
    %cst_112 = arith.constant dense<0.000000e+00> : vector<2x8xf32>
    %187 = vector.multi_reduction <add>, %186, %cst_112 [2] : vector<2x8x16xf32> to vector<2x8xf32>
    %188 = vector.shape_cast %187 : vector<2x8xf32> to vector<2x8x1xf32>
    %189 = vector.broadcast %188 : vector<2x8x1xf32> to vector<2x8x16xf32>
    %190 = arith.divf %186, %189 : vector<2x8x16xf32>
    "tpu.trace_start"() <{level = 10 : i32, message = "bqk,bkd->bqd"}> : () -> ()
    %cst_113 = arith.constant dense<0.000000e+00> : vector<2x8x8xf32>
    %191 = tpu.matmul %190, %180, %cst_113 {dimension_numbers = #tpu.dot_dimension_numbers<[2], [1], [1], [2], [0, 0, 0, 1, 1, 2], [0], [0]>} : vector<2x8x16xf32>, vector<2x16x8xf32>, vector<2x8x8xf32> -> vector<2x8x8xf32>
    "tpu.trace_stop"() : () -> ()
    %192 = vector.extract_strided_slice %157 {offsets = [0, 0, 16], sizes = [2, 8, 8], strides = [1, 1, 1]} : vector<2x8x32xf32> to vector<2x8x8xf32>
    %cst_114 = arith.constant 0.353553385 : f32
    %193 = vector.broadcast %cst_114 : f32 to vector<2x8x8xf32>
    %194 = arith.mulf %192, %193 : vector<2x8x8xf32>
    %195 = vector.extract_strided_slice %158 {offsets = [0, 0, 16], sizes = [2, 16, 8], strides = [1, 1, 1]} : vector<2x16x32xf32> to vector<2x16x8xf32>
    %196 = vector.extract_strided_slice %159 {offsets = [0, 0, 16], sizes = [2, 16, 8], strides = [1, 1, 1]} : vector<2x16x32xf32> to vector<2x16x8xf32>
    "tpu.trace_start"() <{level = 10 : i32, message = "bqd,bkd->bqk"}> : () -> ()
    %cst_115 = arith.constant dense<0.000000e+00> : vector<2x8x16xf32>
    %197 = tpu.matmul %194, %195, %cst_115 {dimension_numbers = #tpu.dot_dimension_numbers<[2], [2], [1], [1], [0, 0, 0, 1, 1, 1], [0], [0]>} : vector<2x8x8xf32>, vector<2x16x8xf32>, vector<2x8x16xf32> -> vector<2x8x16xf32>
    "tpu.trace_stop"() : () -> ()
    %cst_116 = arith.constant dense<0xFF800000> : vector<2x8xf32>
    %198 = vector.multi_reduction <maximumf>, %197, %cst_116 [2] : vector<2x8x16xf32> to vector<2x8xf32>
    %199 = vector.shape_cast %198 : vector<2x8xf32> to vector<2x8x1xf32>
    %200 = vector.broadcast %199 : vector<2x8x1xf32> to vector<2x8x16xf32>
    %201 = arith.subf %197, %200 : vector<2x8x16xf32>
    %202 = math.exp %201 : vector<2x8x16xf32>
    %cst_117 = arith.constant dense<0.000000e+00> : vector<2x8xf32>
    %203 = vector.multi_reduction <add>, %202, %cst_117 [2] : vector<2x8x16xf32> to vector<2x8xf32>
    %204 = vector.shape_cast %203 : vector<2x8xf32> to vector<2x8x1xf32>
    %205 = vector.broadcast %204 : vector<2x8x1xf32> to vector<2x8x16xf32>
    %206 = arith.divf %202, %205 : vector<2x8x16xf32>
    "tpu.trace_start"() <{level = 10 : i32, message = "bqk,bkd->bqd"}> : () -> ()
    %cst_118 = arith.constant dense<0.000000e+00> : vector<2x8x8xf32>
    %207 = tpu.matmul %206, %196, %cst_118 {dimension_numbers = #tpu.dot_dimension_numbers<[2], [1], [1], [2], [0, 0, 0, 1, 1, 2], [0], [0]>} : vector<2x8x16xf32>, vector<2x16x8xf32>, vector<2x8x8xf32> -> vector<2x8x8xf32>
    "tpu.trace_stop"() : () -> ()
    %208 = vector.extract_strided_slice %157 {offsets = [0, 0, 24], sizes = [2, 8, 8], strides = [1, 1, 1]} : vector<2x8x32xf32> to vector<2x8x8xf32>
    %cst_119 = arith.constant 0.353553385 : f32
    %209 = vector.broadcast %cst_119 : f32 to vector<2x8x8xf32>
    %210 = arith.mulf %208, %209 : vector<2x8x8xf32>
    %211 = vector.extract_strided_slice %158 {offsets = [0, 0, 24], sizes = [2, 16, 8], strides = [1, 1, 1]} : vector<2x16x32xf32> to vector<2x16x8xf32>
    %212 = vector.extract_strided_slice %159 {offsets = [0, 0, 24], sizes = [2, 16, 8], strides = [1, 1, 1]} : vector<2x16x32xf32> to vector<2x16x8xf32>
    "tpu.trace_start"() <{level = 10 : i32, message = "bqd,bkd->bqk"}> : () -> ()
    %cst_120 = arith.constant dense<0.000000e+00> : vector<2x8x16xf32>
    %213 = tpu.matmul %210, %211, %cst_120 {dimension_numbers = #tpu.dot_dimension_numbers<[2], [2], [1], [1], [0, 0, 0, 1, 1, 1], [0], [0]>} : vector<2x8x8xf32>, vector<2x16x8xf32>, vector<2x8x16xf32> -> vector<2x8x16xf32>
    "tpu.trace_stop"() : () -> ()
    %cst_121 = arith.constant dense<0xFF800000> : vector<2x8xf32>
    %214 = vector.multi_reduction <maximumf>, %213, %cst_121 [2] : vector<2x8x16xf32> to vector<2x8xf32>
    %215 = vector.shape_cast %214 : vector<2x8xf32> to vector<2x8x1xf32>
    %216 = vector.broadcast %215 : vector<2x8x1xf32> to vector<2x8x16xf32>
    %217 = arith.subf %213, %216 : vector<2x8x16xf32>
    %218 = math.exp %217 : vector<2x8x16xf32>
    %cst_122 = arith.constant dense<0.000000e+00> : vector<2x8xf32>
    %219 = vector.multi_reduction <add>, %218, %cst_122 [2] : vector<2x8x16xf32> to vector<2x8xf32>
    %220 = vector.shape_cast %219 : vector<2x8xf32> to vector<2x8x1xf32>
    %221 = vector.broadcast %220 : vector<2x8x1xf32> to vector<2x8x16xf32>
    %222 = arith.divf %218, %221 : vector<2x8x16xf32>
    "tpu.trace_start"() <{level = 10 : i32, message = "bqk,bkd->bqd"}> : () -> ()
    %cst_123 = arith.constant dense<0.000000e+00> : vector<2x8x8xf32>
    %223 = tpu.matmul %222, %212, %cst_123 {dimension_numbers = #tpu.dot_dimension_numbers<[2], [1], [1], [2], [0, 0, 0, 1, 1, 2], [0], [0]>} : vector<2x8x16xf32>, vector<2x16x8xf32>, vector<2x8x8xf32> -> vector<2x8x8xf32>
    "tpu.trace_stop"() : () -> ()
    %224 = tpu.concatenate %175, %191, %207, %223 in 2 : vector<2x8x8xf32>, vector<2x8x8xf32>, vector<2x8x8xf32>, vector<2x8x8xf32> -> vector<2x8x32xf32>
    %225 = vector.shape_cast %224 : vector<2x8x32xf32> to vector<16x32xf32>
    %c0_124 = arith.constant 0 : index
    %c3_125 = arith.constant 3 : index
    %c0_126 = arith.constant 0 : index
    %c0_127 = arith.constant 0 : index
    %226 = vector.load %arg7[%c0_124, %c3_125, %c0_126, %c0_127] : memref<1x4x32x32xf32, #tpu.memory_space<vmem>>, vector<1x1x32x32xf32>
    %227 = vector.shape_cast %226 : vector<1x1x32x32xf32> to vector<32x32xf32>
    %cst_128 = arith.constant dense<0.000000e+00> : vector<16x32xf32>
    %228 = tpu.matmul %225, %227, %cst_128 {dimension_numbers = #tpu.dot_dimension_numbers<[1], [0], [0], [1], [0, 0, 1, 1], [], []>} : vector<16x32xf32>, vector<32x32xf32>, vector<16x32xf32> -> vector<16x32xf32>
    %c0_129 = arith.constant 0 : index
    %c3_130 = arith.constant 3 : index
    %c0_131 = arith.constant 0 : index
    %c0_132 = arith.constant 0 : index
    %229 = vector.load %arg8[%c0_129, %c3_130, %c0_131, %c0_132] : memref<1x4x1x32xf32, #tpu.memory_space<vmem>>, vector<1x1x1x32xf32>
    %230 = vector.shape_cast %229 : vector<1x1x1x32xf32> to vector<1x32xf32>
    %231 = vector.broadcast %230 : vector<1x32xf32> to vector<16x32xf32>
    %232 = arith.addf %228, %231 : vector<16x32xf32>
    %233 = arith.addf %133, %232 : vector<16x32xf32>
    %c0_133 = arith.constant 0 : index
    %c1_134 = arith.constant 1 : index
    %c0_135 = arith.constant 0 : index
    %c0_136 = arith.constant 0 : index
    %234 = vector.load %arg13[%c0_133, %c1_134, %c0_135, %c0_136] : memref<1x3x1x32xf32, #tpu.memory_space<vmem>>, vector<1x1x1x32xf32>
    %235 = vector.shape_cast %234 : vector<1x1x1x32xf32> to vector<1x32xf32>
    %c0_137 = arith.constant 0 : index
    %c1_138 = arith.constant 1 : index
    %c0_139 = arith.constant 0 : index
    %c0_140 = arith.constant 0 : index
    %236 = vector.load %arg14[%c0_137, %c1_138, %c0_139, %c0_140] : memref<1x3x1x32xf32, #tpu.memory_space<vmem>>, vector<1x1x1x32xf32>
    %237 = vector.shape_cast %236 : vector<1x1x1x32xf32> to vector<1x32xf32>
    %cst_141 = arith.constant dense<0.000000e+00> : vector<16xf32>
    %238 = vector.multi_reduction <add>, %233, %cst_141 [1] : vector<16x32xf32> to vector<16xf32>
    %239 = vector.shape_cast %238 : vector<16xf32> to vector<16x1xf32>
    %cst_142 = arith.constant 3.200000e+01 : f32
    %240 = vector.broadcast %cst_142 : f32 to vector<16x1xf32>
    %241 = arith.divf %239, %240 : vector<16x1xf32>
    %242 = vector.broadcast %241 : vector<16x1xf32> to vector<16x32xf32>
    %243 = arith.subf %233, %242 : vector<16x32xf32>
    %244 = arith.mulf %243, %243 : vector<16x32xf32>
    %cst_143 = arith.constant dense<0.000000e+00> : vector<16xf32>
    %245 = vector.multi_reduction <add>, %244, %cst_143 [1] : vector<16x32xf32> to vector<16xf32>
    %246 = vector.shape_cast %245 : vector<16xf32> to vector<16x1xf32>
    %cst_144 = arith.constant 3.200000e+01 : f32
    %247 = vector.broadcast %cst_144 : f32 to vector<16x1xf32>
    %248 = arith.divf %246, %247 : vector<16x1xf32>
    %cst_145 = arith.constant 9.99999974E-6 : f32
    %249 = vector.broadcast %cst_145 : f32 to vector<16x1xf32>
    %250 = arith.addf %248, %249 : vector<16x1xf32>
    %251 = math.rsqrt %250 : vector<16x1xf32>
    %252 = vector.broadcast %251 : vector<16x1xf32> to vector<16x32xf32>
    %253 = arith.mulf %243, %252 : vector<16x32xf32>
    %254 = vector.broadcast %235 : vector<1x32xf32> to vector<16x32xf32>
    %255 = arith.mulf %253, %254 : vector<16x32xf32>
    %256 = vector.broadcast %237 : vector<1x32xf32> to vector<16x32xf32>
    %257 = arith.addf %255, %256 : vector<16x32xf32>
    %c0_146 = arith.constant 0 : index
    %c0_147 = arith.constant 0 : index
    %c0_148 = arith.constant 0 : index
    %258 = vector.load %arg9[%c0_146, %c0_147, %c0_148] : memref<1x32x64xf32, #tpu.memory_space<vmem>>, vector<1x32x64xf32>
    %259 = vector.shape_cast %258 : vector<1x32x64xf32> to vector<32x64xf32>
    %cst_149 = arith.constant dense<0.000000e+00> : vector<16x64xf32>
    %260 = tpu.matmul %257, %259, %cst_149 {dimension_numbers = #tpu.dot_dimension_numbers<[1], [0], [0], [1], [0, 0, 1, 1], [], []>} : vector<16x32xf32>, vector<32x64xf32>, vector<16x64xf32> -> vector<16x64xf32>
    %c0_150 = arith.constant 0 : index
    %c0_151 = arith.constant 0 : index
    %c0_152 = arith.constant 0 : index
    %261 = vector.load %arg10[%c0_150, %c0_151, %c0_152] : memref<1x1x64xf32, #tpu.memory_space<vmem>>, vector<1x1x64xf32>
    %262 = vector.shape_cast %261 : vector<1x1x64xf32> to vector<1x64xf32>
    %263 = vector.broadcast %262 : vector<1x64xf32> to vector<16x64xf32>
    %264 = arith.addf %260, %263 : vector<16x64xf32>
    %cst_153 = arith.constant 0.000000e+00 : f32
    %265 = vector.broadcast %cst_153 : f32 to vector<16x64xf32>
    %266 = arith.maximumf %264, %265 : vector<16x64xf32>
    %c0_154 = arith.constant 0 : index
    %c0_155 = arith.constant 0 : index
    %c0_156 = arith.constant 0 : index
    %267 = vector.load %arg11[%c0_154, %c0_155, %c0_156] : memref<1x64x32xf32, #tpu.memory_space<vmem>>, vector<1x64x32xf32>
    %268 = vector.shape_cast %267 : vector<1x64x32xf32> to vector<64x32xf32>
    %cst_157 = arith.constant dense<0.000000e+00> : vector<16x32xf32>
    %269 = tpu.matmul %266, %268, %cst_157 {dimension_numbers = #tpu.dot_dimension_numbers<[1], [0], [0], [1], [0, 0, 1, 1], [], []>} : vector<16x64xf32>, vector<64x32xf32>, vector<16x32xf32> -> vector<16x32xf32>
    %c0_158 = arith.constant 0 : index
    %c0_159 = arith.constant 0 : index
    %c0_160 = arith.constant 0 : index
    %270 = vector.load %arg12[%c0_158, %c0_159, %c0_160] : memref<1x1x32xf32, #tpu.memory_space<vmem>>, vector<1x1x32xf32>
    %271 = vector.shape_cast %270 : vector<1x1x32xf32> to vector<1x32xf32>
    %272 = vector.broadcast %271 : vector<1x32xf32> to vector<16x32xf32>
    %273 = arith.addf %269, %272 : vector<16x32xf32>
    %274 = arith.addf %257, %273 : vector<16x32xf32>
    %c0_161 = arith.constant 0 : index
    %c2_162 = arith.constant 2 : index
    %c0_163 = arith.constant 0 : index
    %c0_164 = arith.constant 0 : index
    %275 = vector.load %arg13[%c0_161, %c2_162, %c0_163, %c0_164] : memref<1x3x1x32xf32, #tpu.memory_space<vmem>>, vector<1x1x1x32xf32>
    %276 = vector.shape_cast %275 : vector<1x1x1x32xf32> to vector<1x32xf32>
    %c0_165 = arith.constant 0 : index
    %c2_166 = arith.constant 2 : index
    %c0_167 = arith.constant 0 : index
    %c0_168 = arith.constant 0 : index
    %277 = vector.load %arg14[%c0_165, %c2_166, %c0_167, %c0_168] : memref<1x3x1x32xf32, #tpu.memory_space<vmem>>, vector<1x1x1x32xf32>
    %278 = vector.shape_cast %277 : vector<1x1x1x32xf32> to vector<1x32xf32>
    %cst_169 = arith.constant dense<0.000000e+00> : vector<16xf32>
    %279 = vector.multi_reduction <add>, %274, %cst_169 [1] : vector<16x32xf32> to vector<16xf32>
    %280 = vector.shape_cast %279 : vector<16xf32> to vector<16x1xf32>
    %cst_170 = arith.constant 3.200000e+01 : f32
    %281 = vector.broadcast %cst_170 : f32 to vector<16x1xf32>
    %282 = arith.divf %280, %281 : vector<16x1xf32>
    %283 = vector.broadcast %282 : vector<16x1xf32> to vector<16x32xf32>
    %284 = arith.subf %274, %283 : vector<16x32xf32>
    %285 = arith.mulf %284, %284 : vector<16x32xf32>
    %cst_171 = arith.constant dense<0.000000e+00> : vector<16xf32>
    %286 = vector.multi_reduction <add>, %285, %cst_171 [1] : vector<16x32xf32> to vector<16xf32>
    %287 = vector.shape_cast %286 : vector<16xf32> to vector<16x1xf32>
    %cst_172 = arith.constant 3.200000e+01 : f32
    %288 = vector.broadcast %cst_172 : f32 to vector<16x1xf32>
    %289 = arith.divf %287, %288 : vector<16x1xf32>
    %cst_173 = arith.constant 9.99999974E-6 : f32
    %290 = vector.broadcast %cst_173 : f32 to vector<16x1xf32>
    %291 = arith.addf %289, %290 : vector<16x1xf32>
    %292 = math.rsqrt %291 : vector<16x1xf32>
    %293 = vector.broadcast %292 : vector<16x1xf32> to vector<16x32xf32>
    %294 = arith.mulf %284, %293 : vector<16x32xf32>
    %295 = vector.broadcast %276 : vector<1x32xf32> to vector<16x32xf32>
    %296 = arith.mulf %294, %295 : vector<16x32xf32>
    %297 = vector.broadcast %278 : vector<1x32xf32> to vector<16x32xf32>
    %298 = arith.addf %296, %297 : vector<16x32xf32>
    %299 = vector.shape_cast %298 : vector<16x32xf32> to vector<2x8x32xf32>
    %c0_174 = arith.constant 0 : index
    %c0_175 = arith.constant 0 : index
    %c0_176 = arith.constant 0 : index
    %300 = vector.load %arg17[%c0_174, %c0_175, %c0_176] : memref<2x8x32xf32, #tpu.memory_space<vmem>>, vector<2x8x32xf32>
    tpu.vector_store %arg17[%c0_174, %c0_175, %c0_176], %299 {strides = array<i32>} : memref<2x8x32xf32, #tpu.memory_space<vmem>>, vector<2x8x32xf32>,
    %c1_i32 = arith.constant 1 : i32
    %301 = arith.cmpi eq, %arg0, %c1_i32 : i32
    %302 = arith.extui %301 : i1 to i32
    %c0_i32_177 = arith.constant 0 : i32
    %303 = arith.cmpi ne, %302, %c0_i32_177 : i32
    scf.if %303 {
      %c0_178 = arith.constant 0 : index
      %c0_179 = arith.constant 0 : index
      %c0_180 = arith.constant 0 : index
      %304 = vector.load %arg15[%c0_178, %c0_179, %c0_180] : memref<1x1x32xf32, #tpu.memory_space<vmem>>, vector<1x1x32xf32>
      %305 = vector.shape_cast %304 : vector<1x1x32xf32> to vector<1x32xf32>
      %c0_181 = arith.constant 0 : index
      %c0_182 = arith.constant 0 : index
      %c0_183 = arith.constant 0 : index
      %306 = vector.load %arg16[%c0_181, %c0_182, %c0_183] : memref<1x1x32xf32, #tpu.memory_space<vmem>>, vector<1x1x32xf32>
      %307 = vector.shape_cast %306 : vector<1x1x32xf32> to vector<1x32xf32>
      %cst_184 = arith.constant dense<0.000000e+00> : vector<16xf32>
      %308 = vector.multi_reduction <add>, %298, %cst_184 [1] : vector<16x32xf32> to vector<16xf32>
      %309 = vector.shape_cast %308 : vector<16xf32> to vector<16x1xf32>
      %cst_185 = arith.constant 3.200000e+01 : f32
      %310 = vector.broadcast %cst_185 : f32 to vector<16x1xf32>
      %311 = arith.divf %309, %310 : vector<16x1xf32>
      %312 = vector.broadcast %311 : vector<16x1xf32> to vector<16x32xf32>
      %313 = arith.subf %298, %312 : vector<16x32xf32>
      %314 = arith.mulf %313, %313 : vector<16x32xf32>
      %cst_186 = arith.constant dense<0.000000e+00> : vector<16xf32>
      %315 = vector.multi_reduction <add>, %314, %cst_186 [1] : vector<16x32xf32> to vector<16xf32>
      %316 = vector.shape_cast %315 : vector<16xf32> to vector<16x1xf32>
      %cst_187 = arith.constant 3.200000e+01 : f32
      %317 = vector.broadcast %cst_187 : f32 to vector<16x1xf32>
      %318 = arith.divf %316, %317 : vector<16x1xf32>
      %cst_188 = arith.constant 9.99999974E-6 : f32
      %319 = vector.broadcast %cst_188 : f32 to vector<16x1xf32>
      %320 = arith.addf %318, %319 : vector<16x1xf32>
      %321 = math.rsqrt %320 : vector<16x1xf32>
      %322 = vector.broadcast %321 : vector<16x1xf32> to vector<16x32xf32>
      %323 = arith.mulf %313, %322 : vector<16x32xf32>
      %324 = vector.broadcast %305 : vector<1x32xf32> to vector<16x32xf32>
      %325 = arith.mulf %323, %324 : vector<16x32xf32>
      %326 = vector.broadcast %307 : vector<1x32xf32> to vector<16x32xf32>
      %327 = arith.addf %325, %326 : vector<16x32xf32>
      %328 = vector.shape_cast %327 : vector<16x32xf32> to vector<2x8x32xf32>
      %c0_189 = arith.constant 0 : index
      %c0_190 = arith.constant 0 : index
      %c0_191 = arith.constant 0 : index
      %329 = vector.load %arg17[%c0_189, %c0_190, %c0_191] : memref<2x8x32xf32, #tpu.memory_space<vmem>>, vector<2x8x32xf32>
      tpu.vector_store %arg17[%c0_189, %c0_190, %c0_191], %328 {strides = array<i32>} : memref<2x8x32xf32, #tpu.memory_space<vmem>>, vector<2x8x32xf32>,
    } else {
    }
    return
  }
  func.func @transform_0(%arg0: i32) -> (i32, i32, i32) {
    %c0_i32 = arith.constant 0 : i32
    %c0_i32_0 = arith.constant 0 : i32
    %c0_i32_1 = arith.constant 0 : i32
    %c0_i32_2 = arith.constant 0 : i32
    return %c0_i32, %c0_i32_0, %c0_i32_1 : i32, i32, i32
  }
  func.func @transform_1(%arg0: i32) -> (i32, i32, i32) {
    %c0_i32 = arith.constant 0 : i32
    %c0_i32_0 = arith.constant 0 : i32
    %c0_i32_1 = arith.constant 0 : i32
    %c0_i32_2 = arith.constant 0 : i32
    return %c0_i32, %c0_i32_0, %c0_i32_1 : i32, i32, i32
  }
  func.func @transform_2(%arg0: i32) -> (i32, i32, i32) {
    %c0_i32 = arith.constant 0 : i32
    %c0_i32_0 = arith.constant 0 : i32
    %c0_i32_1 = arith.constant 0 : i32
    %c0_i32_2 = arith.constant 0 : i32
    return %c0_i32, %c0_i32_0, %c0_i32_1 : i32, i32, i32
  }
  func.func @transform_3(%arg0: i32) -> (i32, i32, i32) {
    %c0_i32 = arith.constant 0 : i32
    %c0_i32_0 = arith.constant 0 : i32
    %c0_i32_1 = arith.constant 0 : i32
    %c0_i32_2 = arith.constant 0 : i32
    return %c0_i32, %c0_i32_0, %c0_i32_1 : i32, i32, i32
  }
  func.func @transform_4(%arg0: i32) -> (i32, i32, i32, i32) {
    %c0_i32 = arith.constant 0 : i32
    %c0_i32_0 = arith.constant 0 : i32
    %c0_i32_1 = arith.constant 0 : i32
    %c0_i32_2 = arith.constant 0 : i32
    return %arg0, %c0_i32, %c0_i32_0, %c0_i32_1 : i32, i32, i32, i32
  }
  func.func @transform_5(%arg0: i32) -> (i32, i32, i32, i32) {
    %c0_i32 = arith.constant 0 : i32
    %c0_i32_0 = arith.constant 0 : i32
    %c0_i32_1 = arith.constant 0 : i32
    %c0_i32_2 = arith.constant 0 : i32
    return %arg0, %c0_i32, %c0_i32_0, %c0_i32_1 : i32, i32, i32, i32
  }
  func.func @transform_6(%arg0: i32) -> (i32, i32, i32, i32) {
    %c0_i32 = arith.constant 0 : i32
    %c0_i32_0 = arith.constant 0 : i32
    %c0_i32_1 = arith.constant 0 : i32
    %c0_i32_2 = arith.constant 0 : i32
    return %arg0, %c0_i32, %c0_i32_0, %c0_i32_1 : i32, i32, i32, i32
  }
  func.func @transform_7(%arg0: i32) -> (i32, i32, i32, i32) {
    %c0_i32 = arith.constant 0 : i32
    %c0_i32_0 = arith.constant 0 : i32
    %c0_i32_1 = arith.constant 0 : i32
    %c0_i32_2 = arith.constant 0 : i32
    return %arg0, %c0_i32, %c0_i32_0, %c0_i32_1 : i32, i32, i32, i32
  }
  func.func @transform_8(%arg0: i32) -> (i32, i32, i32) {
    %c0_i32 = arith.constant 0 : i32
    %c0_i32_0 = arith.constant 0 : i32
    %c0_i32_1 = arith.constant 0 : i32
    return %arg0, %c0_i32, %c0_i32_0 : i32, i32, i32
  }
  func.func @transform_9(%arg0: i32) -> (i32, i32, i32) {
    %c0_i32 = arith.constant 0 : i32
    %c0_i32_0 = arith.constant 0 : i32
    %c0_i32_1 = arith.constant 0 : i32
    return %arg0, %c0_i32, %c0_i32_0 : i32, i32, i32
  }
  func.func @transform_10(%arg0: i32) -> (i32, i32, i32) {
    %c0_i32 = arith.constant 0 : i32
    %c0_i32_0 = arith.constant 0 : i32
    %c0_i32_1 = arith.constant 0 : i32
    return %arg0, %c0_i32, %c0_i32_0 : i32, i32, i32
  }
  func.func @transform_11(%arg0: i32) -> (i32, i32, i32) {
    %c0_i32 = arith.constant 0 : i32
    %c0_i32_0 = arith.constant 0 : i32
    %c0_i32_1 = arith.constant 0 : i32
    return %arg0, %c0_i32, %c0_i32_0 : i32, i32, i32
  }
  func.func @transform_12(%arg0: i32) -> (i32, i32, i32, i32) {
    %c0_i32 = arith.constant 0 : i32
    %c0_i32_0 = arith.constant 0 : i32
    %c0_i32_1 = arith.constant 0 : i32
    %c0_i32_2 = arith.constant 0 : i32
    return %arg0, %c0_i32, %c0_i32_0, %c0_i32_1 : i32, i32, i32, i32
  }
  func.func @transform_13(%arg0: i32) -> (i32, i32, i32, i32) {
    %c0_i32 = arith.constant 0 : i32
    %c0_i32_0 = arith.constant 0 : i32
    %c0_i32_1 = arith.constant 0 : i32
    %c0_i32_2 = arith.constant 0 : i32
    return %arg0, %c0_i32, %c0_i32_0, %c0_i32_1 : i32, i32, i32, i32
  }
  func.func @transform_14(%arg0: i32) -> (i32, i32, i32) {
    %c0_i32 = arith.constant 0 : i32
    %c0_i32_0 = arith.constant 0 : i32
    %c0_i32_1 = arith.constant 0 : i32
    %c0_i32_2 = arith.constant 0 : i32
    return %c0_i32, %c0_i32_0, %c0_i32_1 : i32, i32, i32
  }
  func.func @transform_15(%arg0: i32) -> (i32, i32, i32) {
    %c0_i32 = arith.constant 0 : i32
    %c0_i32_0 = arith.constant 0 : i32
    %c0_i32_1 = arith.constant 0 : i32
    %c0_i32_2 = arith.constant 0 : i32
    return %c0_i32, %c0_i32_0, %c0_i32_1 : i32, i32, i32
  }
  func.func @transform_16(%arg0: i32) -> (i32, i32, i32) {
    %c0_i32 = arith.constant 0 : i32
    %c0_i32_0 = arith.constant 0 : i32
    %c0_i32_1 = arith.constant 0 : i32
    %c0_i32_2 = arith.constant 0 : i32
    return %c0_i32, %c0_i32_0, %c0_i32_1 : i32, i32, i32
  }
}

</mosaic_0001>

<bundles_post_ra>
// kernel: tpu_custom_call.1
= control target key start
LH: loop header
LB: loop body
LE: loop exit
PB: predicated region body
PF: predicated region fallthrough
CT: control target
= control target key end

     0   :  { %s6608_s0 = inlined_call_operand.vmem [shape: f32[2,8,32], index: 0, kind: input, shape index: {}]   ;;  %s6609_s1 = inlined_call_operand.vmem [shape: f32[2,16,32], index: 1, kind: input, shape index: {}]   ;;  %s6610_s2 = inlined_call_operand.vmem [shape: f32[2,8,32], index: 2, kind: input, shape index: {}]   ;;  %s6611_s3 = inlined_call_operand.vmem [shape: f32[2,16,32], index: 3, kind: input, shape index: {}]   ;;  %s6612_s4 = inlined_call_operand.hbm [shape: f32[2,4,32,32], index: 4, kind: input, shape index: {}]   ;;  %s6613_s5 = inlined_call_operand.vmem [shape: f32[2,4,1,32], index: 5, kind: input, shape index: {}]   ;;  %s6614_s6 = inlined_call_operand.hbm [shape: f32[2,4,32,32], index: 6, kind: input, shape index: {}]   ;;  %s6615_s7 = inlined_call_operand.vmem [shape: f32[2,4,1,32], index: 7, kind: input, shape index: {}]   ;;  %s6616_s8 = inlined_call_operand.vmem [shape: f32[2,32,64], index: 8, kind: input, shape index: {}]   ;;  %s6617_s9 = inlined_call_operand.vmem [shape: f32[2,1,64], index: 9, kind: input, shape index: {}]   ;;  %s6618_s10 = inlined_call_operand.vmem [shape: f32[2,64,32], index: 10, kind: input, shape index: {}]   ;;  %s6619_s11 = inlined_call_operand.vmem [shape: f32[2,1,32], index: 11, kind: input, shape index: {}]   ;;  %s6620_s12 = inlined_call_operand.vmem [shape: f32[2,3,1,32], index: 12, kind: input, shape index: {}]   ;;  %s6621_s13 = inlined_call_operand.vmem [shape: f32[2,3,1,32], index: 13, kind: input, shape index: {}]   ;;  %s6622_s14 = inlined_call_operand.vmem [shape: f32[1,1,32], index: 14, kind: input, shape index: {}]   ;;  %s6623_s15 = inlined_call_operand.vmem [shape: f32[1,1,32], index: 15, kind: input, shape index: {}]   ;;  %s6624_s16 = inlined_call_operand.hbm [shape: f32[2,8,32], index: 16, kind: output, shape index: {}]  }
   0x1   :  { %6636 = sst [smem:[#allocation15_spill]] %s6608_s0 }
   0x2   :  { %6637 = sst [smem:[#allocation16_spill]] %s6611_s3 }
   0x3   :  { %6638 = sst [smem:[#allocation17_spill]] %s6612_s4 }
   0x4   :  { %6639 = sst [smem:[#allocation18_spill]] %s6613_s5 }
   0x5   :  { %6640 = sst [smem:[#allocation19_spill]] %s6614_s6 }
   0x6   :  { %6641 = sst [smem:[#allocation20_spill]] %s6615_s7 }
   0x7   :  { %6642 = sst [smem:[#allocation21_spill]] %s6622_s14 }
   0x8   :  { %6643 = sst [smem:[#allocation22_spill]] %s6623_s15 }
   0x9   :  { %6644 = sst [smem:[#allocation23_spill]] %s6624_s16 }
   0xa   :  { %21 = vsyncpa [#allocation3], 0 }
   0xb   :  { %23 = vsyncpa [#allocation3 + $0x1], 0 }
   0xc   :  { %24 = vsyncpa [#allocation6], 0 }
   0xd   :  { %26 = vsyncpa [#allocation6 + $0x1], 0 }
   0xe   :  { %27 = vsyncpa [#allocation4], 0  ;;  %s5797_s21 = smov 0   ;;  %s5799_s22 = smov 0  }
   0xf   :  { %s5801_s23 = smov 0   ;;  %s5803_s24 = smov 0  }
  0x10 LB: > { %6645 = sst [smem:[#allocation11_spill]] %s5688_s22  ;;  %s5816_s25 = sadd.s32 4294967295, %s5696_s24   ;;  %s5696_s24 = sphi %s5803_s24, %s6670_s24   ;;  %s5692_s23 = sphi %s5801_s23, %s6673_s23   ;;  %s5688_s22 = sphi %s5799_s22, %s6672_s22   ;;  %s5684_s21 = sphi %s5797_s21, %s6671_s21  }
  0x11   : > { %6646 = sst [smem:[#allocation12_spill]] %s5692_s23  ;;  %s5819_s26 = sadd.s32 1, %s5696_s24  }
  0x12   : > { %6647 = sst [smem:[#allocation13_spill]] %s5819_s26  ;;  %s121_s27 = ssub.s32 %s5696_s24, %s5819_s26 }
  0x13   : > { %s124_s28 = sadd.s32 1, %s5692_s23  ;;  %p122_p0 = scmp.eq.s32.totalorder %s121_s27, 0 }
  0x14   : > { %p131_p1 = scmp.ne.s32.totalorder %s5692_s23, %s5688_s22  ;;  %p132_p2 = scmp.eq.s32.totalorder %s5696_s24, 0 }
  0x15   : > { %p137_p3 = scmp.ne.s32.totalorder %s5688_s22, %s5684_s21  ;;  %p138_p5 = scmp.eq.s32.totalorder %s5816_s25, 0 }
  0x16   : > { %s5829_s29 = scalar_select %p122_p0, %s5692_s23, %s124_s28  }
  0x17   : > { %p133_p4 = por %p132_p2, %p131_p1  ;;  %p5447_p6 = scmp.lt.s32.totalorder %s5696_s24, 2 }
  0x18   : > { %6648 = sst [smem:[#allocation14_spill]] %s5829_s29  ;;  %p5833_p7 = por %p138_p5, %p137_p3 }
  0x19   : > { %s5838_s0 = sand.u32 1, %s5692_s23   ;;  %s6630_s18 = sshll.u32 %s5696_s24, 11 }
  0x1a   : > { %s6649_s30 = scalar_select %p5833_p7, 1, 0 }
  0x1b   : > { %s6629_s17 = sshll.u32 %s5838_s0, 7  ;;  %s6650_s4 = sld [smem:[#allocation17_spill]] }
  0x1c   : > { %s480_s27 = scalar_lea.vmem [#allocation2], %s6629_s17  ;;  %p5853_p8 = pnand %p5447_p6, %p133_p4 }
  0x1d   : > { %s487_s28 = sshll.u32 %s480_s27, 4  ;;  %s5851_s28 = int_to_ptr.vmem [resolvable:$true] %s487_s28 }
  0x1e   : > { %p5576_p11 = pneg %p5853_p8 }
  0x21   : > { %s5847_s21 = scalar_lea.hbm %s6650_s4, %s6630_s18  ;;  %s5579_s27 = scalar_lea.hbm %s6650_s4, 4096 }
  0x22   : > { %s5574_s26 = scalar_lea.hbm %s5847_s21, 2048  ;;  %p5580_p0 = scmp.lt.s32.totalorder %s5847_s21, %s6650_s4 }
  0x23   : > { %p5575_p10 = scmp.ne.s32.totalorder %s5847_s21, %s5574_s26  ;;  %p5581_p1 = scmp.lt.s32.totalorder %s5579_s27, %s5574_s26 }
  0x25   : > { %p5577_p12 = pnand %p5576_p11, %p5575_p10  ;;  %p5582_p2 = por %p5581_p1, %p5580_p0 }
  0x27   : > { %p5578_p13 = pneg %p5577_p12 }
  0x29   : > { %p5583_p3 = pnand %p5582_p2, %p5578_p13 }
  0x2b   : > { %5586 = shalt.err (!%p5583_p3)
}
  0x2c   : > { %s5587_s23 = scalar_lea.vmem %s5851_s28, 2048  ;;  %s5698_s19 = smov [#allocation2]  }
  0x2d   : > { %p5588_p4 = scmp.ne.s32.totalorder %s5851_s28, %s5587_s23  ;;  %s5592_s20 = sshll.u32 %s5698_s19, 4  ;;  %s5593_s20 = int_to_ptr.vmem [resolvable:$false] %s5592_s20 }
  0x2e   : > { %s5594_s16 = scalar_lea.vmem %s5593_s20, 4096  ;;  %p5595_p10 = scmp.lt.s32.totalorder %s5851_s28, %s5593_s20 }
  0x2f   : > { %p5590_p5 = pnand %p5588_p4, %p5576_p11  ;;  %p5596_p12 = scmp.lt.s32.totalorder %s5594_s16, %s5587_s23 }
  0x31   : > { %p5591_p6 = pneg %p5590_p5  ;;  %p5597_p9 = por %p5596_p12, %p5595_p10 }
  0x33   : > { %p5598_p0 = pnand %p5597_p9, %p5591_p6 }
  0x35   : > { %5601 = shalt.err (!%p5598_p0)
}
  0x36   : > { %s5699_s26 = smov 128   ;;  %s5700_s17 = smov 8  }
  0x37   : > { %s6652_s16 = scalar_lea.sflag [#allocation3], %s5838_s0  ;;  %p572_p9 = scmp.lt.s32.totalorder %s5696_s24, 3 }
  0x38   : > { %5443 = dma.hbm_to_vmem [thread:$0]  (!%p5853_p8), %s5847_s21, 2048, %s5851_s28, %s6652_s16, %s5699_s26, %s5699_s26, %s5700_s17  }
  0x39   : > { %s6653_s23 = sshll.u32 %s5696_s24, 11  ;;  %s6654_s6 = sld [smem:[#allocation19_spill]] }
  0x3a   : > { %p6655_p13 = scmp.ge.s32.totalorder %s5696_s24, 1  ;;  %s6657_s4 = sshll.u32 %s5838_s0, 7 }
  0x3b   : > { %s508_s15 = scalar_lea.vmem [#allocation5], %s6657_s4  ;;  %s505_s21 = scalar_lea.sflag [#allocation6], %s5838_s0 }
  0x3c   : > { %p5898_p1 = pnand %p6655_p13, %p572_p9  ;;  %s515_s14 = sshll.u32 %s508_s15, 4  ;;  %s5904_s14 = int_to_ptr.vmem [resolvable:$true] %s515_s14 }
  0x3f   : > { %s5894_s19 = scalar_lea.hbm %s6654_s6, %s6653_s23  ;;  %s5607_s23 = scalar_lea.hbm %s6654_s6, 4096 }
  0x40   : > { %s5602_s28 = scalar_lea.hbm %s5894_s19, 2048  ;;  %p5608_p5 = scmp.lt.s32.totalorder %s5894_s19, %s6654_s6 }
  0x41   : > { %p5603_p2 = scmp.ne.s32.totalorder %s5894_s19, %s5602_s28  ;;  %p5609_p6 = scmp.lt.s32.totalorder %s5607_s23, %s5602_s28 }
  0x43   : > { %p5605_p3 = pnand %p5603_p2, %p5576_p11  ;;  %p5610_p10 = por %p5609_p6, %p5608_p5 }
  0x45   : > { %p5606_p4 = pneg %p5605_p3 }
  0x47   : > { %p5611_p12 = pnand %p5610_p10, %p5606_p4 }
  0x49   : > { %5614 = shalt.err (!%p5611_p12)
}
  0x4a   : > { %s5615_s4 = scalar_lea.vmem %s5904_s14, 2048  ;;  %s5701_s15 = smov [#allocation5]  }
  0x4b   : > { %p5616_p0 = scmp.ne.s32.totalorder %s5904_s14, %s5615_s4  ;;  %s5620_s0 = sshll.u32 %s5701_s15, 4  ;;  %s5621_s0 = int_to_ptr.vmem [resolvable:$false] %s5620_s0 }
  0x4c   : > { %s5622_s24 = scalar_lea.vmem %s5621_s0, 4096  ;;  %p5623_p2 = scmp.lt.s32.totalorder %s5904_s14, %s5621_s0 }
  0x4d   : > { %p5618_p9 = pnand %p5616_p0, %p5576_p11  ;;  %p5624_p3 = scmp.lt.s32.totalorder %s5622_s24, %s5615_s4 }
  0x4f   : > { %p5619_p13 = pneg %p5618_p9  ;;  %p5625_p7 = por %p5624_p3, %p5623_p2 }
  0x51   : > { %p5626_p5 = pnand %p5625_p7, %p5619_p13 }
  0x53   : > { %5629 = shalt.err (!%p5626_p5)
}
  0x54   : > { %5446 = dma.hbm_to_vmem [thread:$0]  (!%p5853_p8), %s5894_s19, 2048, %s5904_s14, %s505_s21, %s5699_s26, %s5699_s26, %s5700_s17  }
  0x55   : > { %576 = sbr.rel (%p5898_p1) target bundleno = 7292 (0x1c7c), region = 84  ;;  %s578_s28 = sand.u32 (!%p5898_p1), 1, %s5688_s22  }
  0x56   : > { %s4817_s16 = sshll.u32 (!%p5898_p1), %s578_s28, 7  ;;  %s579_s23 = scalar_lea.sflag (!%p5898_p1), [#allocation3], %s578_s28 }
  0x57   : > { %s5935_s18 = scalar_lea.vmem (!%p5898_p1), [#allocation2], %s4817_s16  ;;  %p6658_p7 = scmp.ne.s32.totalorder (!%p5898_p1), %s6649_s30, 0 }
  0x5a   : > { %5671 = dma.done.wait (%p6658_p7), %s579_s23, 2048  }
  0x5b   : > { %5673 = vsyncadd (%p6658_p7), %s579_s23, 4294965248  ;;  %s588_s29 = scalar_lea.sflag [#allocation6], %s578_s28  ;;  %s5941_s27 = scalar_lea.vmem [#allocation5], %s4817_s16 }
  0x5c   : > { %5675 = dma.done.wait (%p6658_p7), %s588_s29, 2048  }
  0x5d   : > { %5677 = vsyncadd (%p6658_p7), %s588_s29, 4294965248  ;;  %p672_p8 = scmp.lt.s32.totalorder %s5816_s25, 1  ;;  %s6659_s5 = sld [smem:[#allocation18_spill]] }
  0x5e   : > { %s6660_s7 = sld [smem:[#allocation20_spill]]  ;;  %p4825_p11 = scmp.ne.s32.totalorder %s5816_s25, 0 }
  0x5f   : > { %s5949_s14 = scalar_select %p672_p8, %s5816_s25, 1 }
  0x60   : > { %s6661_s23 = sld [smem:[#allocation15_spill]] (!%p4825_p11) }
  0x61   : > { %s4819_s26 = sshll.u32 %s5949_s14, 2  ;;  %s4965_s17 = sshll.u32 %s5949_s14, 5 }
  0x62   : > { %s5966_s28 = scalar_lea.vmem %s6616_s8, %s4965_s17  ;;  %s4966_s6 = sshll.u32 %s5949_s14, 6 }
  0x63   : > { %s5956_s21 = scalar_lea.vmem %s6659_s5, %s4819_s26  ;;  %s5980_s30 = scalar_lea.vmem %s6618_s10, %s4966_s6 }
  0x64   : > { %s5961_s15 = scalar_lea.vmem %s6660_s7, %s4819_s26  ;;  %s5431_s26 = smul.u32 3, %s5949_s14 }
  0x65   : > { %707 = sbr.rel (%p4825_p11) target bundleno = 108 (0x6c), region = 96 }
  0x66   : > { %s5986_s17 = scalar_lea.vmem %s6620_s12, %s5431_s26  ;;  %s5991_s16 = scalar_lea.vmem %s6621_s13, %s5431_s26 }
  0x67   : > { %s6662_s19 = smov (!%p4825_p11), %s6661_s23 }
  0x6a   : > { %v708_v0 = vld [vmem:[%s6661_s23] sm:$0xff]  ;;  %vm710_vm0 = vcmask 261120   ;;  %v709_v1 = vld [vmem:[%s6662_s19 + $0x8] sm:$0xff] }
  0x6b   : > { %711 = vst.msk [vmem:[#allocation7] sm:$0xff] %vm710_vm0, %v708_v0  ;;  %712 = vst.msk [vmem:[#allocation7 + $0x8] sm:$0xff] %vm710_vm0, %v709_v1 }
  0x6c PF: > { %v730_v2 = vld [vmem:[%s5935_s18 + $0x18] sm:$0xff]  ;;  %v729_v3 = vld [vmem:[%s5935_s18 + $0x10] sm:$0xff]  ;;  %v6007_v5 = vld [vmem:[%s6610_s2] sm:$0xff]  ;;  %vm738_vm1 = vcmask 261120   ;;  %v5702_v16 = vmov 0.0   ;;  %vm5703_vm2 = vmmov 0  }
  0x6d   : > { %5115 = vmatprep.subr.mxu1 %v730_v2  ;;  %v728_v6 = vld [vmem:[%s5935_s18 + $0x8] sm:$0xff]  ;;  %v727_v10 = vld [vmem:[%s5935_s18] sm:$0xff]  ;;  %v4832_v12 = vld [vmem:[%s5935_s18 + $0x38] sm:$0xff]  ;;  %vm1004_vm3 = vcmask 64512   ;;  %s5704_s0 = smov 120   ;;  %s5705_s24 = smov 112  }
  0x6e   : > { %5116 = vmatpush3.msra.mxu1 %v730_v2  ;;  %v6017_v9 = vld [vmem:[%s6610_s2 + $0x8] sm:$0xff]  ;;  %v4831_v13 = vld [vmem:[%s5935_s18 + $0x30] sm:$0xff]  ;;  %v4829_v15 = vld [vmem:[%s5935_s18 + $0x20] sm:$0xff]  ;;  %s5706_s3 = smov 104   ;;  %s5707_s22 = smov 8   ;;  %vm2346_vm4 = vcmask 195584  }
  0x6f   : > { %5117 = vmatprep.subr.mxu1 %v729_v3  ;;  %v4830_v14 = vld [vmem:[%s5935_s18 + $0x28] sm:$0xff]  ;;  %v4826_v18 = vld [vmem:[%s5956_s21] ss:$0 sm:$0xff]  ;;  %v4834_v20 = vld [vmem:[%s5956_s21 + $0x1] ss:$0 sm:$0xff]  ;;  %s5708_s23 = smov 16  }
  0x70   : > { %5118 = vmatpush3.msra.mxu1 %v729_v3  ;;  %v4840_v29 = vld [vmem:[%s5935_s18 + $0x58] sm:$0xff]  ;;  %v4839_v30 = vld [vmem:[%s5935_s18 + $0x50] sm:$0xff]  ;;  %v4838_v31 = vld [vmem:[%s5935_s18 + $0x48] sm:$0xff]  ;;  %s6634_s5 = smov 24   ;;  %vm2343_vm5 = vcmask 130048   ;;  %s6663_s20 = sld [smem:[#allocation16_spill]] }
  0x71   : > { %5119 = vmatprep.subr.mxu1 %v728_v6  ;;  %5137 = vmatprep.subr.mxu0 %v4840_v29  ;;  %v4837_v32 = vld [vmem:[%s5935_s18 + $0x40] sm:$0xff]  ;;  %vm4453_vm6 = vcmask 523264   ;;  %p4956_p1 = scmp.ne.s32.totalorder %s5816_s25, 1 }
  0x72   : > { %v6002_v4 = vld [vmem:[#allocation7] sm:$0xff]  ;;  %v6012_v8 = vld [vmem:[#allocation7 + $0x8] sm:$0xff]  ;;  %5120 = vmatpush3.msra.mxu1 %v728_v6  ;;  %5138 = vmatpush3.msra.mxu0 %v4840_v29 }
  0x73   : > { %v725_v7 = vadd.f32 %v6007_v5, %v6002_v4  ;;  %5145 = vmatprep.mubr.msk.f32.mxu0 %vm738_vm1, %v6002_v4  ;;  %v726_v11 = vadd.f32 %v6017_v9, %v6012_v8  ;;  %5121 = vmatprep.subr.mxu1 %v727_v10  ;;  %v4842_v50 = vld [vmem:[%s5956_s21 + $0x2] ss:$0 sm:$0xff] }
  0x74   : > { %5122 = vmatpush3.msra.mxu1 %v727_v10  ;;  %5139 = vmatprep.subr.mxu0 %v4839_v30 }
  0x75   : > { %5123 = vmatprep.mubr.msk.f32.mxu1 %vm738_vm1, %v725_v7  ;;  %5126 = vmatprep.subr.mxu1 %v4832_v12 }
  0x76   : > { %5124 = vmatmul.mubr.msk.f32.vlgmr.msra.gmra.mxu1 %vm738_vm1, %v726_v11  ;;  %5140 = vmatpush3.msra.mxu0 %v4839_v30 }
  0x77   : > { %5127 = vmatpush3.msra.mxu1 %v4832_v12  ;;  %5134 = vmatprep.mubr.msk.f32.mxu1 %vm738_vm1, %v725_v7 }
  0x78   : > { %5128 = vmatprep.subr.mxu1 %v4831_v13  ;;  %5141 = vmatprep.subr.mxu0 %v4838_v31 }
  0x79   : > { %5129 = vmatpush3.msra.mxu1 %v4831_v13  ;;  %5142 = vmatpush3.msra.mxu0 %v4838_v31 }
  0x7a   : > { %5130 = vmatprep.subr.mxu1 %v4830_v14  ;;  %5143 = vmatprep.subr.mxu0 %v4837_v32 }
  0x7b   : > { %5131 = vmatpush3.msra.mxu1 %v4830_v14  ;;  %5144 = vmatpush3.msra.mxu0 %v4837_v32 }
  0x7c   : > { %5132 = vmatprep.subr.mxu1 %v4829_v15  ;;  %5146 = vmatmul.mubr.msk.f32.vlgmr.msra.gmra.mxu0 %vm738_vm1, %v6012_v8 }
  0x7d   : > { %5133 = vmatpush3.msra.mxu1 %v4829_v15  ;;  %5158 = vmatprep.subr.mxu0 %v5702_v16 }
  0x7e   : > { %5135 = vmatmul.mubr.msk.f32.vlgmr.msra.gmra.mxu1 %vm738_vm1, %v726_v11  ;;  %5148 = vmatprep.subr.mxu1 %v5702_v16 }
  0x7f   : > { %5150 = vmatprep.mubr.msk.f32.mxu1 %vm5703_vm2, %v5702_v16  ;;  %5160 = vmatprep.mubr.msk.f32.mxu0 %vm5703_vm2, %v5702_v16 }
 0x136   : > { %v5125_v17 = vpop.f32.mrf.mxu1 }
 0x137   : > { %v817_v27 = vadd.f32 %v5125_v17, %v4826_v18 }
 0x138   : > { %v811_v19 = vpop.f32.mrf.mxu1 }
 0x139   : > { %v812_v22 = vadd.f32 %v4826_v18, %v811_v19  ;;  %v6056_v28 = vmul.f32 0.35355338, %v817_v27 }
 0x13b   : > { %v6043_v26 = vmul.f32 0.35355338, %v812_v22 }
 0x13c   : > { %v5147_v49 = vpop.f32.mrf.mxu0 }
 0x13d   : > { %v6079_v51 = vadd.f32 %v5147_v49, %v4842_v50 }
 0x13e   : > { %v5136_v21 = vpop.f32.mrf.mxu1  ;;  %v993_v52 = vpop.f32.mrf.mxu0 }
 0x13f   : > { %v6037_v23 = vadd.f32 %v5136_v21, %v4834_v20  ;;  %v6082_v53 = vadd.f32 %v4842_v50, %v993_v52 }
 0x140   : > { %v899_v24 = vpop.f32.mrf.mxu1 }
 0x141   : > { %v6039_v25 = vadd.f32 %v4834_v20, %v899_v24  ;;  %1405 = vrot.lane.b32.xlu1 %v6037_v23, %s5704_s0  ;;  %5159 = vmatpush3.msra.mxu0 %v6082_v53 }
 0x142   : > { %5168 = vmatprep.subr.mxu0 %v5702_v16 }
 0x143   : > { %5149 = vmatpush3.xpose.msk.msra.mxu1 %vm1004_vm3, %v6039_v25 }
 0x144   : > { %5153 = vmatprep.subr.mxu1 %v5702_v16 }
 0x145   : > { %1325 = vrot.lane.b32.xlu1 %v6043_v26, %s5704_s0 }
 0x146   : > { %5151 = vmatmul.mubr.msk.f32.vlgmr.msra.gmra.mxu1 %vm1004_vm3, %v6043_v26 }
 0x147   : > { %5154 = vmatpush3.xpose.msk.msra.mxu1 %vm1004_vm3, %v6037_v23  ;;  %5155 = vmatprep.mubr.msk.f32.mxu1 %vm5703_vm2, %v5702_v16 }
 0x148   : > { %5163 = vmatprep.subr.mxu1 %v5702_v16 }
 0x14a   : > { %5156 = vmatmul.mubr.msk.f32.vlgmr.msra.gmra.mxu1 %vm1004_vm3, %v6056_v28 }
 0x14b   : > { %5165 = vmatprep.mubr.msk.f32.mxu1 %vm5703_vm2, %v5702_v16  ;;  %5164 = vmatpush3.msra.mxu1 %v6079_v51 }
 0x14c   : > { %5173 = vmatprep.subr.mxu1 %v5702_v16 }
 0x1b3   : > { %v1406_v54 = vpop.permute.xlu1 %1405 }
 0x1b7   : > { %v1326_v55 = vpop.permute.xlu1 %1325 }
 0x206   : > { %v1077_v33 = vpop.f32.mrf.mxu1 }
 0x207   : > { %v1157_v34 = vsel %vm1004_vm3, %v1077_v33, -inf }
 0x208   : > { %1158 = vmax.xlane.f32.xlu0 %v1157_v34  ;;  %v5152_v35 = vpop.f32.mrf.mxu1 }
 0x20a   : > { %v1153_v36 = vpop.f32.mrf.mxu1 }
 0x20b   : > { %v1160_v37 = vsel %vm1004_vm3, %v1153_v36, -inf }
 0x20c   : > { %1161 = vmax.xlane.f32.xlu0 %v1160_v37  ;;  %v5157_v38 = vpop.f32.mrf.mxu1 }
 0x222   : > { %1327 = vrot.lane.b32.xlu0 %v6039_v25, %s5704_s0 }
 0x291   : > { %v1159_v39 = vpop.xlane.xlu0 %1158 }
 0x292   : > { %v1163_v40 = vsub.f32 %v1077_v33, %v1159_v39 }
 0x294   : > { %v1165_v41 = vmul.f32 1.442695, %v1163_v40 }
 0x295   : > { %v1162_v42 = vpop.xlane.xlu0 %1161 }
 0x296   : > { %5494 = vpow2.f32 %v1165_v41  ;;  %v1164_v43 = vsub.f32 %v1153_v36, %v1162_v42 }
 0x298   : > { %v1167_v44 = vmul.f32 1.442695, %v1164_v43 }
 0x299   : > { %v1328_v60 = vpop.permute.xlu0 %1327 }
 0x29a   : > { %5496 = vpow2.f32 %v1167_v44 }
 0x2a3   : > { %v5495_v45 = vpop.eup %5494 }
 0x2a4   : > { %v1169_v46 = vsel %vm1004_vm3, %v5495_v45, 0.0 }
 0x2a5   : > { %1170 = vadd.xlane.f32.xlu1 %v1169_v46 }
 0x2a7   : > { %v5497_v47 = vpop.eup %5496 }
 0x2a8   : > { %v1172_v48 = vsel %vm1004_vm3, %v5497_v47, 0.0 }
 0x2a9   : > { %1173 = vadd.xlane.f32.xlu1 %v1172_v48 }
 0x2ba   : > { %1403 = vrot.lane.b32.xlu1 %v6056_v28, %s5704_s0 }
 0x32e   : > { %v1171_v56 = vpop.xlane.xlu1 %1170 }
 0x32f   : > { %5498 = vrcp.f32 %v1171_v56 }
 0x332   : > { %v1174_v57 = vpop.xlane.xlu1 %1173 }
 0x333   : > { %5500 = vrcp.f32 %v1174_v57 }
 0x336   : > { %v1404_v63 = vpop.permute.xlu1 %1403 }
 0x33c   : > { %v5499_v58 = vpop.eup %5498 }
 0x33d   : > { %v1176_v59 = vmul.f32 %v5499_v58, %v5495_v45 }
 0x33f   : > { %5161 = vmatmul.mubr.msk.f32.vlgmr.msra.gmra.mxu0 %vm1004_vm3, %v1176_v59 }
 0x340   : > { %v5501_v61 = vpop.eup %5500  ;;  %5169 = vmatpush3.xpose.msk.msra.mxu0 %vm1004_vm3, %v1328_v60  ;;  %5170 = vmatprep.mubr.msk.f32.mxu0 %vm5703_vm2, %v5702_v16 }
 0x341   : > { %v1178_v62 = vmul.f32 %v5501_v61, %v5497_v47  ;;  %5178 = vmatprep.subr.mxu0 %v5702_v16 }
 0x343   : > { %5166 = vmatmul.mubr.msk.f32.vlgmr.msra.gmra.mxu1 %vm1004_vm3, %v1178_v62  ;;  %5171 = vmatmul.mubr.msk.f32.vlgmr.msra.gmra.mxu0 %vm1004_vm3, %v1326_v55 }
 0x344   : > { %5174 = vmatpush3.xpose.msk.msra.mxu1 %vm1004_vm3, %v1406_v54  ;;  %5175 = vmatprep.mubr.msk.f32.mxu1 %vm5703_vm2, %v5702_v16 }
 0x345   : > { %5183 = vmatprep.subr.mxu1 %v5702_v16  ;;  %5180 = vmatprep.mubr.msk.f32.mxu0 %vm5703_vm2, %v5702_v16 }
 0x347   : > { %5176 = vmatmul.mubr.msk.f32.vlgmr.msra.gmra.mxu1 %vm1004_vm3, %v1404_v63 }
 0x348   : > { %5185 = vmatprep.mubr.msk.f32.mxu1 %vm5703_vm2, %v5702_v16 }
 0x3ff   : > { %v6105_v0 = vpop.f32.mrf.mxu0 }
 0x401   : > { %v5162_v1 = vpop.f32.mrf.mxu0 }
 0x403   : > { %v6107_v2 = vpop.f32.mrf.mxu1  ;;  %v1399_v3 = vpop.f32.mrf.mxu0 }
 0x404   : > { %v1481_v6 = vsel %vm1004_vm3, %v1399_v3, -inf }
 0x405   : > { %1482 = vmax.xlane.f32.xlu0 %v1481_v6  ;;  %v5167_v7 = vpop.f32.mrf.mxu1  ;;  %v5172_v10 = vpop.f32.mrf.mxu0 }
 0x407   : > { %v1477_v11 = vpop.f32.mrf.mxu1 }
 0x408   : > { %v1484_v12 = vsel %vm1004_vm3, %v1477_v11, -inf }
 0x409   : > { %1485 = vmax.xlane.f32.xlu1 %v1484_v12  ;;  %v5177_v13 = vpop.f32.mrf.mxu1 }
 0x41a   : > { %1581 = vrot.lane.b32.xlu1 %v6079_v51, %s5704_s0 }
 0x41b   : > { %1504 = vrot.lane.b32.xlu0 %v6082_v53, %s5704_s0 }
 0x41e   : > { %1659 = vrot.lane.b32.xlu1 %v6039_v25, %s5705_s24 }
 0x422   : > { %1737 = vrot.lane.b32.xlu1 %v6037_v23, %s5705_s24 }
 0x426   : > { %1735 = vrot.lane.b32.xlu1 %v6056_v28, %s5705_s24 }
 0x48e   : > { %v1483_v14 = vpop.xlane.xlu0 %1482 }
 0x48f   : > { %v1487_v15 = vsub.f32 %v1399_v3, %v1483_v14 }
 0x491   : > { %v1489_v17 = vmul.f32 1.442695, %v1487_v15 }
 0x492   : > { %v1505_v18 = vpop.permute.xlu0 %1504  ;;  %v1486_v19 = vpop.xlane.xlu1 %1485 }
 0x493   : > { %5502 = vpow2.f32 %v1489_v17  ;;  %v1488_v20 = vsub.f32 %v1477_v11, %v1486_v19  ;;  %5179 = vmatpush3.msra.mxu0 %v1505_v18 }
 0x494   : > { %5188 = vmatprep.subr.mxu0 %v5702_v16 }
 0x495   : > { %v1491_v21 = vmul.f32 1.442695, %v1488_v20 }
 0x496   : > { %v1582_v22 = vpop.permute.xlu1 %1581 }
 0x497   : > { %5504 = vpow2.f32 %v1491_v21  ;;  %5184 = vmatpush3.msra.mxu1 %v1582_v22 }
 0x498   : > { %5193 = vmatprep.subr.mxu1 %v5702_v16 }
 0x49a   : > { %v1660_v33 = vpop.permute.xlu1 %1659 }
 0x49e   : > { %v1738_v37 = vpop.permute.xlu1 %1737 }
 0x4a0   : > { %v5503_v24 = vpop.eup %5502 }
 0x4a1   : > { %v1493_v27 = vsel %vm1004_vm3, %v5503_v24, 0.0 }
 0x4a2   : > { %1494 = vadd.xlane.f32.xlu0 %v1493_v27  ;;  %v1736_v40 = vpop.permute.xlu1 %1735 }
 0x4a4   : > { %v5505_v29 = vpop.eup %5504 }
 0x4a5   : > { %v1496_v30 = vsel %vm1004_vm3, %v5505_v29, 0.0 }
 0x4a6   : > { %1497 = vadd.xlane.f32.xlu0 %v1496_v30 }
 0x4bc   : > { %1657 = vrot.lane.b32.xlu0 %v6043_v26, %s5705_s24 }
 0x52b   : > { %v1495_v31 = vpop.xlane.xlu0 %1494 }
 0x52c   : > { %5506 = vrcp.f32 %v1495_v31 }
 0x52f   : > { %v1498_v32 = vpop.xlane.xlu0 %1497 }
 0x530   : > { %5508 = vrcp.f32 %v1498_v32 }
 0x533   : > { %v1658_v39 = vpop.permute.xlu0 %1657 }
 0x539   : > { %v5507_v34 = vpop.eup %5506 }
 0x53a   : > { %v1500_v35 = vmul.f32 %v5507_v34, %v5503_v24 }
 0x53c   : > { %5181 = vmatmul.mubr.msk.f32.vlgmr.msra.gmra.mxu0 %vm1004_vm3, %v1500_v35 }
 0x53d   : > { %v5509_v36 = vpop.eup %5508  ;;  %5189 = vmatpush3.xpose.msk.msra.mxu0 %vm1004_vm3, %v1660_v33  ;;  %5190 = vmatprep.mubr.msk.f32.mxu0 %vm5703_vm2, %v5702_v16 }
 0x53e   : > { %v1502_v38 = vmul.f32 %v5509_v36, %v5505_v29  ;;  %5198 = vmatprep.subr.mxu0 %v5702_v16 }
 0x540   : > { %5186 = vmatmul.mubr.msk.f32.vlgmr.msra.gmra.mxu1 %vm1004_vm3, %v1502_v38  ;;  %5191 = vmatmul.mubr.msk.f32.vlgmr.msra.gmra.mxu0 %vm1004_vm3, %v1658_v39 }
 0x541   : > { %5194 = vmatpush3.xpose.msk.msra.mxu1 %vm1004_vm3, %v1738_v37  ;;  %5195 = vmatprep.mubr.msk.f32.mxu1 %vm5703_vm2, %v5702_v16 }
 0x542   : > { %5203 = vmatprep.subr.mxu1 %v5702_v16  ;;  %5200 = vmatprep.mubr.msk.f32.mxu0 %vm5703_vm2, %v5702_v16 }
 0x544   : > { %5196 = vmatmul.mubr.msk.f32.vlgmr.msra.gmra.mxu1 %vm1004_vm3, %v1736_v40 }
 0x545   : > { %5205 = vmatprep.mubr.msk.f32.mxu1 %vm5703_vm2, %v5702_v16 }
 0x5fc   : > { %v6143_v41 = vpop.f32.mrf.mxu0 }
 0x5fe   : > { %v5182_v42 = vpop.f32.mrf.mxu0 }
 0x600   : > { %v6145_v43 = vpop.f32.mrf.mxu1  ;;  %v1731_v44 = vpop.f32.mrf.mxu0 }
 0x601   : > { %v1813_v45 = vsel %vm1004_vm3, %v1731_v44, -inf }
 0x602   : > { %1814 = vmax.xlane.f32.xlu0 %v1813_v45  ;;  %v5187_v46 = vpop.f32.mrf.mxu1  ;;  %v5192_v47 = vpop.f32.mrf.mxu0  ;;  %v4872_v45 = vld [vmem:[%s5935_s18 + $0x78] sm:$0xff] }
 0x603   : > { %v4870_v46 = vld [vmem:[%s5935_s18 + $0x68] sm:$0xff]  ;;  %v4869_v47 = vld [vmem:[%s5935_s18 + $0x60] sm:$0xff] }
 0x604   : > { %v1809_v48 = vpop.f32.mrf.mxu1 }
 0x605   : > { %v1816_v49 = vsel %vm1004_vm3, %v1809_v48, -inf }
 0x606   : > { %1817 = vmax.xlane.f32.xlu1 %v1816_v49  ;;  %v5197_v50 = vpop.f32.mrf.mxu1 }
 0x617   : > { %1911 = vrot.lane.b32.xlu1 %v6079_v51, %s5705_s24 }
 0x618   : > { %1835 = vrot.lane.b32.xlu0 %v6082_v53, %s5705_s24 }
 0x61b   : > { %1989 = vrot.lane.b32.xlu1 %v6039_v25, %s5706_s3 }
 0x61f   : > { %2067 = vrot.lane.b32.xlu1 %v6037_v23, %s5706_s3 }
 0x623   : > { %2065 = vrot.lane.b32.xlu1 %v6056_v28, %s5706_s3 }
 0x68b   : > { %v1815_v52 = vpop.xlane.xlu0 %1814 }
 0x68c   : > { %v1819_v54 = vsub.f32 %v1731_v44, %v1815_v52 }
 0x68e   : > { %v1821_v55 = vmul.f32 1.442695, %v1819_v54 }
 0x68f   : > { %v1836_v56 = vpop.permute.xlu0 %1835  ;;  %v1818_v57 = vpop.xlane.xlu1 %1817 }
 0x690   : > { %5510 = vpow2.f32 %v1821_v55  ;;  %v1820_v58 = vsub.f32 %v1809_v48, %v1818_v57  ;;  %5199 = vmatpush3.msra.mxu0 %v1836_v56 }
 0x691   : > { %5208 = vmatprep.subr.mxu0 %v5702_v16 }
 0x692   : > { %v1823_v59 = vmul.f32 1.442695, %v1820_v58 }
 0x693   : > { %v1912_v60 = vpop.permute.xlu1 %1911 }
 0x694   : > { %5512 = vpow2.f32 %v1823_v59  ;;  %5204 = vmatpush3.msra.mxu1 %v1912_v60 }
 0x695   : > { %5213 = vmatprep.subr.mxu1 %v5702_v16 }
 0x697   : > { %v1990_v1 = vpop.permute.xlu1 %1989 }
 0x69b   : > { %v2068_v10 = vpop.permute.xlu1 %2067 }
 0x69d   : > { %v5511_v23 = vpop.eup %5510 }
 0x69e   : > { %v1825_v25 = vsel %vm1004_vm3, %v5511_v23, 0.0 }
 0x69f   : > { %1826 = vadd.xlane.f32.xlu0 %v1825_v25  ;;  %v2066_v12 = vpop.permute.xlu1 %2065 }
 0x6a1   : > { %v5513_v28 = vpop.eup %5512 }
 0x6a2   : > { %v1828_v61 = vsel %vm1004_vm3, %v5513_v28, 0.0 }
 0x6a3   : > { %1829 = vadd.xlane.f32.xlu0 %v1828_v61 }
 0x6b9   : > { %1987 = vrot.lane.b32.xlu0 %v6043_v26, %s5706_s3 }
 0x728   : > { %v1827_v62 = vpop.xlane.xlu0 %1826 }
 0x729   : > { %5514 = vrcp.f32 %v1827_v62 }
 0x72c   : > { %v1830_v63 = vpop.xlane.xlu0 %1829 }
 0x72d   : > { %5516 = vrcp.f32 %v1830_v63 }
 0x730   : > { %v1988_v26 = vpop.permute.xlu0 %1987 }
 0x736   : > { %v5515_v3 = vpop.eup %5514 }
 0x737   : > { %v1832_v6 = vmul.f32 %v5515_v3, %v5511_v23 }
 0x739   : > { %5201 = vmatmul.mubr.msk.f32.vlgmr.msra.gmra.mxu0 %vm1004_vm3, %v1832_v6 }
 0x73a   : > { %v5517_v7 = vpop.eup %5516  ;;  %5209 = vmatpush3.xpose.msk.msra.mxu0 %vm1004_vm3, %v1990_v1  ;;  %5210 = vmatprep.mubr.msk.f32.mxu0 %vm5703_vm2, %v5702_v16 }
 0x73b   : > { %v1834_v11 = vmul.f32 %v5517_v7, %v5513_v28  ;;  %5218 = vmatprep.subr.mxu0 %v5702_v16 }
 0x73d   : > { %5206 = vmatmul.mubr.msk.f32.vlgmr.msra.gmra.mxu1 %vm1004_vm3, %v1834_v11  ;;  %5211 = vmatmul.mubr.msk.f32.vlgmr.msra.gmra.mxu0 %vm1004_vm3, %v1988_v26 }
 0x73e   : > { %5214 = vmatpush3.xpose.msk.msra.mxu1 %vm1004_vm3, %v2068_v10  ;;  %5215 = vmatprep.mubr.msk.f32.mxu1 %vm5703_vm2, %v5702_v16 }
 0x73f   : > { %5223 = vmatprep.subr.mxu1 %v5702_v16  ;;  %5220 = vmatprep.mubr.msk.f32.mxu0 %vm5703_vm2, %v5702_v16 }
 0x741   : > { %5216 = vmatmul.mubr.msk.f32.vlgmr.msra.gmra.mxu1 %vm1004_vm3, %v2066_v12 }
 0x742   : > { %5225 = vmatprep.mubr.msk.f32.mxu1 %vm5703_vm2, %v5702_v16 }
 0x7f9   : > { %v1907_v13 = vpop.f32.mrf.mxu0 }
 0x7fb   : > { %v5202_v14 = vpop.f32.mrf.mxu0 }
 0x7fd   : > { %v1983_v15 = vpop.f32.mrf.mxu1  ;;  %v2061_v17 = vpop.f32.mrf.mxu0 }
 0x7fe   : > { %v2143_v18 = vsel %vm1004_vm3, %v2061_v17, -inf }
 0x7ff   : > { %2144 = vmax.xlane.f32.xlu0 %v2143_v18  ;;  %v5207_v19 = vpop.f32.mrf.mxu1  ;;  %v5212_v20 = vpop.f32.mrf.mxu0 }
 0x800   : > { %v4885_v20 = vld [vmem:[%s5941_s27 + $0x38] sm:$0xff] }
 0x801   : > { %v2139_v21 = vpop.f32.mrf.mxu1 }
 0x802   : > { %v2146_v22 = vsel %vm1004_vm3, %v2139_v21, -inf }
 0x803   : > { %2147 = vmax.xlane.f32.xlu1 %v2146_v22  ;;  %v5217_v24 = vpop.f32.mrf.mxu1  ;;  %v6229_v22 = vld [vmem:[%s6609_s1] sm:$0xff] }
 0x804   : > { %v721_v24 = vld [vmem:[%s6663_s20] sm:$0xff] }
 0x814   : > { %2241 = vrot.lane.b32.xlu1 %v6079_v51, %s5706_s3 }
 0x818   : > { %2319 = vrot.lane.b32.xlu1 %v6143_v41, %s5707_s22 }
 0x81c   : > { %2321 = vrot.lane.b32.xlu1 %v6145_v43, %s5707_s22 }
 0x820   : > { %2329 = vrot.lane.b32.xlu1 %v1983_v15, %s5708_s23 }
 0x888   : > { %v2145_v27 = vpop.xlane.xlu0 %2144 }
 0x889   : > { %v2149_v29 = vsub.f32 %v2061_v17, %v2145_v27  ;;  %v4883_v27 = vld [vmem:[%s5941_s27 + $0x28] sm:$0xff] }
 0x88b   : > { %v2151_v30 = vmul.f32 1.442695, %v2149_v29  ;;  %v2584_v29 = vadd.f32 %v721_v24, %v6229_v22 }
 0x88c   : > { %v2148_v31 = vpop.xlane.xlu1 %2147 }
 0x88d   : > { %5518 = vpow2.f32 %v2151_v30  ;;  %v2150_v32 = vsub.f32 %v2139_v21, %v2148_v31  ;;  %v4884_v21 = vld [vmem:[%s5941_s27 + $0x30] sm:$0xff]  ;;  %v6239_v30 = vld [vmem:[%s6609_s1 + $0x8] sm:$0xff] }
 0x88e   : > { %v722_v31 = vld [vmem:[%s6663_s20 + $0x8] sm:$0xff] }
 0x88f   : > { %v2153_v33 = vmul.f32 1.442695, %v2150_v32  ;;  %v6247_v32 = vld [vmem:[%s6609_s1 + $0x10] sm:$0xff] }
 0x890   : > { %v2242_v34 = vpop.permute.xlu1 %2241 }
 0x891   : > { %5520 = vpow2.f32 %v2153_v33  ;;  %5224 = vmatpush3.msra.mxu1 %v2242_v34  ;;  %v723_v33 = vld [vmem:[%s6663_s20 + $0x10] sm:$0xff]  ;;  %v4882_v34 = vld [vmem:[%s5941_s27 + $0x20] sm:$0xff] }
 0x894   : > { %v2320_v54 = vpop.permute.xlu1 %2319 }
 0x895   : > { %v2341_v57 = vsel %vm1004_vm3, %v6105_v0, %v2320_v54  ;;  %v4874_v0 = vld [vmem:[%s5956_s21 + $0x3] ss:$0 sm:$0xff]  ;;  %v4878_v54 = vld [vmem:[%s5991_s16] ss:$0 sm:$0xff]  ;;  %s6668_s21 = sld [smem:[#allocation22_spill]] (!%p4956_p1) }
 0x898   : > { %v2322_v55 = vpop.permute.xlu1 %2321 }
 0x899   : > { %v2342_v25 = vsel %vm1004_vm3, %v6107_v2, %v2322_v55 }
 0x89a   : > { %v5519_v51 = vpop.eup %5518 }
 0x89b   : > { %v2155_v35 = vsel %vm1004_vm3, %v5519_v51, 0.0 }
 0x89c   : > { %2156 = vadd.xlane.f32.xlu0 %v2155_v35  ;;  %v2330_v58 = vpop.permute.xlu1 %2329  ;;  %v2494_v35 = vld [vmem:[%s5941_s27 + $0x10] sm:$0xff] }
 0x89d   : > { %v2345_v28 = vsel %vm2343_vm5, %v2342_v25, %v2330_v58 }
 0x89e   : > { %v5521_v36 = vpop.eup %5520 }
 0x89f   : > { %v2158_v37 = vsel %vm1004_vm3, %v5521_v36, 0.0 }
 0x8a0   : > { %2159 = vadd.xlane.f32.xlu0 %v2158_v37  ;;  %v2586_v37 = vadd.f32 %v723_v33, %v6247_v32 }
 0x8b6   : > { %2165 = vrot.lane.b32.xlu0 %v6082_v53, %s5706_s3  ;;  %v4871_v53 = vld [vmem:[%s5935_s18 + $0x70] sm:$0xff] }
 0x8ba   : > { %2327 = vrot.lane.b32.xlu0 %v1907_v13, %s5708_s23 }
 0x925   : > { %v2157_v38 = vpop.xlane.xlu0 %2156 }
 0x926   : > { %5522 = vrcp.f32 %v2157_v38  ;;  %v720_v38 = vld [vmem:[%s6609_s1 + $0x18] sm:$0xff] }
 0x929   : > { %v2160_v39 = vpop.xlane.xlu0 %2159 }
 0x92a   : > { %5524 = vrcp.f32 %v2160_v39  ;;  %v724_v39 = vld [vmem:[%s6663_s20 + $0x18] sm:$0xff] }
 0x92d   : > { %v2166_v40 = vpop.permute.xlu0 %2165 }
 0x92e   : > { %5219 = vmatpush3.msra.mxu0 %v2166_v40  ;;  %v2493_v40 = vld [vmem:[%s5941_s27 + $0x8] sm:$0xff] }
 0x92f   : > { %5228 = vmatprep.subr.mxu0 %v4872_v45 }
 0x931   : > { %v2328_v56 = vpop.permute.xlu0 %2327 }
 0x932   : > { %v2344_v59 = vsel %vm2343_vm5, %v2341_v57, %v2328_v56 }
 0x933   : > { %v5523_v41 = vpop.eup %5522 }
 0x934   : > { %v2162_v42 = vmul.f32 %v5523_v41, %v5519_v51  ;;  %v2495_v51 = vld [vmem:[%s5941_s27 + $0x18] sm:$0xff]  ;;  %v2587_v41 = vadd.f32 %v724_v39, %v720_v38 }
 0x935   : > { %5239 = vmatprep.subr.mxu1 %v2495_v51 }
 0x936   : > { %5221 = vmatmul.mubr.msk.f32.vlgmr.msra.gmra.mxu0 %vm1004_vm3, %v2162_v42  ;;  %v2492_v42 = vld [vmem:[%s5941_s27] sm:$0xff] }
 0x937   : > { %v5525_v43 = vpop.eup %5524  ;;  %5229 = vmatpush3.msra.mxu0 %v4872_v45 }
 0x938   : > { %v2164_v44 = vmul.f32 %v5525_v43, %v5521_v36  ;;  %5230 = vmatprep.subr.mxu0 %v4871_v53  ;;  %v2585_v36 = vadd.f32 %v722_v31, %v6239_v30  ;;  %v4895_v43 = vld [vmem:[%s5941_s27 + $0x58] sm:$0xff] }
 0x939   : > { %5231 = vmatpush3.msra.mxu0 %v4871_v53 }
 0x93a   : > { %5226 = vmatmul.mubr.msk.f32.vlgmr.msra.gmra.mxu1 %vm1004_vm3, %v2164_v44  ;;  %5232 = vmatprep.subr.mxu0 %v4870_v46 }
 0x93b   : > { %5233 = vmatpush3.msra.mxu0 %v4870_v46  ;;  %5240 = vmatpush3.msra.mxu1 %v2495_v51 }
 0x93c   : > { %5234 = vmatprep.subr.mxu0 %v4869_v47  ;;  %5241 = vmatprep.subr.mxu1 %v2494_v35 }
 0x93d   : > { %5235 = vmatpush3.msra.mxu0 %v4869_v47  ;;  %5242 = vmatpush3.msra.mxu1 %v2494_v35 }
 0x93e   : > { %5250 = vmatprep.subr.mxu0 %v4885_v20  ;;  %5243 = vmatprep.subr.mxu1 %v2493_v40 }
 0x93f   : > { %5244 = vmatpush3.msra.mxu1 %v2493_v40 }
 0x940   : > { %5245 = vmatprep.subr.mxu1 %v2492_v42 }
 0x941   : > { %5246 = vmatpush3.msra.mxu1 %v2492_v42 }
 0x942   : > { %5264 = vmatprep.subr.mxu1 %v4895_v43 }
 0x9f6   : > { %v2237_v48 = vpop.f32.mrf.mxu0 }
 0x9f7   : > { %2335 = vrot.lane.b32.xlu0 %v2237_v48, %s6634_s5 }
 0x9f8   : > { %v5222_v49 = vpop.f32.mrf.mxu0 }
 0x9fa   : > { %v2313_v50 = vpop.f32.mrf.mxu1 }
 0x9fb   : > { %2337 = vrot.lane.b32.xlu1 %v2313_v50, %s6634_s5  ;;  %v4877_v50 = vld [vmem:[%s5986_s17] ss:$0 sm:$0xff] }
 0x9fc   : > { %v5227_v52 = vpop.f32.mrf.mxu1 }
 0xa69   : > { %v2336_v60 = vpop.permute.xlu0 %2335 }
 0xa6a   : > { %v2347_v23 = vsel %vm2346_vm4, %v2344_v59, %v2336_v60 }
 0xa6b   : > { %5236 = vmatprep.mubr.msk.f32.mxu0 %vm738_vm1, %v2347_v23 }
 0xa6d   : > { %v2338_v61 = vpop.permute.xlu1 %2337 }
 0xa6e   : > { %v2348_v62 = vsel %vm2346_vm4, %v2345_v28, %v2338_v61  ;;  %v4894_v28 = vld [vmem:[%s5941_s27 + $0x50] sm:$0xff]  ;;  %v4893_v61 = vld [vmem:[%s5941_s27 + $0x48] sm:$0xff] }
 0xa6f   : > { %5237 = vmatmul.mubr.msk.f32.vlgmr.msra.gmra.mxu0 %vm738_vm1, %v2348_v62  ;;  %v4892_v62 = vld [vmem:[%s5941_s27 + $0x40] sm:$0xff] }
 0xa70   : > { %5251 = vmatpush3.msra.mxu0 %v4885_v20  ;;  %5258 = vmatprep.mubr.msk.f32.mxu0 %vm738_vm1, %v2584_v29 }
 0xa71   : > { %5252 = vmatprep.subr.mxu0 %v4884_v21 }
 0xa72   : > { %5253 = vmatpush3.msra.mxu0 %v4884_v21 }
 0xa73   : > { %5254 = vmatprep.subr.mxu0 %v4883_v27 }
 0xa74   : > { %5255 = vmatpush3.msra.mxu0 %v4883_v27 }
 0xa75   : > { %5256 = vmatprep.subr.mxu0 %v4882_v34 }
 0xa76   : > { %5257 = vmatpush3.msra.mxu0 %v4882_v34 }
 0xa77   : > { %5259 = vmatmul.mubr.msk.f32.vlgmr.msra.gmra.mxu0 %vm738_vm1, %v2585_v36  ;;  %5278 = vmatprep.subr.mxu0 %v5702_v16 }
 0xa78   : > { %5261 = vmatprep.mubr.msk.f32.mxu0 %vm738_vm1, %v2586_v37 }
 0xa7b   : > { %5262 = vmatmul.mubr.msk.f32.gmra.mxu0 %vm738_vm1, %v2587_v41 }
 0xa7c   : > { %5282 = vmatprep.mubr.msk.f32.mxu0 %vm5703_vm2, %v5702_v16 }
 0xb2f   : > { %v5238_v63 = vpop.f32.mrf.mxu0 }
 0xb30   : > { %v2440_v1 = vadd.f32 %v5238_v63, %v4874_v0 }
 0xb31   : > { %v2434_v3 = vpop.f32.mrf.mxu0 }
 0xb32   : > { %v2435_v6 = vadd.f32 %v4874_v0, %v2434_v3  ;;  %v2444_v7 = vadd.f32 %v2440_v1, %v6012_v8 }
 0xb34   : > { %v2450_v10 = vsel %vm738_vm1, %v2444_v7, 0.0  ;;  %v2443_v11 = vadd.f32 %v2435_v6, %v6002_v4 }
 0xb35   : > { %2451 = vadd.xlane.f32.xlu1 %v2450_v10 }
 0xb36   : > { %v2447_v2 = vsel %vm738_vm1, %v2443_v11, 0.0 }
 0xb37   : > { %2448 = vadd.xlane.f32.xlu0 %v2447_v2 }
 0xbbe   : > { %v2452_v26 = vpop.xlane.xlu1 %2451 }
 0xbbf   : > { %v2455_v12 = vmul.f32 0.03125, %v2452_v26 }
 0xbc0   : > { %v2449_v13 = vpop.xlane.xlu0 %2448 }
 0xbc1   : > { %v2454_v14 = vmul.f32 0.03125, %v2449_v13  ;;  %v6218_v15 = vsub.f32 %v2444_v7, %v2455_v12 }
 0xbc3   : > { %v2456_v17 = vsub.f32 %v2443_v11, %v2454_v14  ;;  %v2459_v4 = vmul.f32 %v6218_v15, %v6218_v15  ;;  %v4879_v11 = vld [vmem:[%s5961_s15] ss:$0 sm:$0xff] }
 0xbc5   : > { %v2458_v18 = vmul.f32 %v2456_v17, %v2456_v17  ;;  %v2463_v19 = vsel %vm738_vm1, %v2459_v4, 0.0 }
 0xbc7   : > { %v2460_v8 = vsel %vm738_vm1, %v2458_v18, 0.0 }
 0xbc8   : > { %2461 = vadd.xlane.f32.xlu0 %v2460_v8 }
 0xbcc   : > { %2464 = vadd.xlane.f32.xlu0 %v2463_v19 }
 0xc51   : > { %v2462_v44 = vpop.xlane.xlu0 %2461 }
 0xc52   : > { %v2466_v45 = vmul.f32 0.03125, %v2462_v44 }
 0xc54   : > { %v2468_v53 = vadd.f32 1e-05, %v2466_v45 }
 0xc55   : > { %v2465_v46 = vpop.xlane.xlu0 %2464 }
 0xc56   : > { %5526 = vrsqrt.f32 %v2468_v53  ;;  %v2467_v47 = vmul.f32 0.03125, %v2465_v46 }
 0xc58   : > { %v2469_v48 = vadd.f32 1e-05, %v2467_v47 }
 0xc5a   : > { %5528 = vrsqrt.f32 %v2469_v48 }
 0xc63   : > { %v5527_v49 = vpop.eup %5526 }
 0xc64   : > { %v2472_v52 = vmul.f32 %v5527_v49, %v2456_v17  ;;  %v4897_v17 = vld [vmem:[%s5961_s15 + $0x2] ss:$0 sm:$0xff] }
 0xc66   : > { %v2480_v55 = vmul.f32 %v4877_v50, %v2472_v52 }
 0xc67   : > { %v5529_v56 = vpop.eup %5528 }
 0xc68   : > { %v2473_v57 = vmul.f32 %v5529_v56, %v6218_v15  ;;  %v6276_v58 = vadd.f32 %v4878_v54, %v2480_v55 }
 0xc6a   : > { %v2481_v59 = vmul.f32 %v4877_v50, %v2473_v57  ;;  %v2490_v60 = vadd.f32 %v6276_v58, %v6007_v5  ;;  %v4887_v5 = vld [vmem:[%s5961_s15 + $0x1] ss:$0 sm:$0xff] }
 0xc6c   : > { %v6280_v23 = vadd.f32 %v4878_v54, %v2481_v59  ;;  %5247 = vmatprep.mubr.msk.f32.mxu1 %vm738_vm1, %v2490_v60 }
 0xc6e   : > { %v2491_v25 = vadd.f32 %v6280_v23, %v6017_v9  ;;  %v5260_v9 = vpop.f32.mrf.mxu0 }
 0xc6f   : > { %v6300_v0 = vadd.f32 %v5260_v9, %v4887_v5 }
 0xc70   : > { %5248 = vmatmul.mubr.msk.f32.vlgmr.msra.gmra.mxu1 %vm738_vm1, %v2491_v25  ;;  %v2679_v63 = vpop.f32.mrf.mxu0 }
 0xc71   : > { %5265 = vmatpush3.msra.mxu1 %v4895_v43  ;;  %5272 = vmatprep.mubr.msk.f32.mxu1 %vm738_vm1, %v6229_v22  ;;  %v6302_v1 = vadd.f32 %v4887_v5, %v2679_v63 }
 0xc72   : > { %5266 = vmatprep.subr.mxu1 %v4894_v28  ;;  %5279 = vmatpush3.xpose.msk.msra.mxu0 %vm1004_vm3, %v6300_v0  ;;  %v5263_v3 = vpop.f32.mrf.mxu0 }
 0xc73   : > { %5267 = vmatpush3.msra.mxu1 %v4894_v28  ;;  %5280 = vmatprep.subr.mxu0 %v5702_v16  ;;  %v6307_v6 = vadd.f32 %v5263_v3, %v4887_v5 }
 0xc74   : > { %5268 = vmatprep.subr.mxu1 %v4893_v61  ;;  %v2689_v7 = vpop.f32.mrf.mxu0 }
 0xc75   : > { %5269 = vmatpush3.msra.mxu1 %v4893_v61  ;;  %v6313_v10 = vadd.f32 %v4887_v5, %v2689_v7 }
 0xc76   : > { %5270 = vmatprep.subr.mxu1 %v4892_v62  ;;  %5281 = vmatpush3.xpose.msk.msra.mxu0 %vm1004_vm3, %v6302_v1 }
 0xc77   : > { %5271 = vmatpush3.msra.mxu1 %v4892_v62  ;;  %5292 = vmatprep.subr.mxu0 %v5702_v16 }
 0xc78   : > { %5285 = vmatprep.subr.mxu1 %v5702_v16  ;;  %5273 = vmatmul.mubr.msk.f32.vlgmr.msra.gmra.mxu1 %vm738_vm1, %v6239_v30 }
 0xc79   : > { %5275 = vmatprep.mubr.msk.f32.mxu1 %vm738_vm1, %v6247_v32  ;;  %5286 = vmatpush3.xpose.msk.msra.mxu1 %vm1004_vm3, %v6307_v6 }
 0xc7a   : > { %5287 = vmatprep.subr.mxu1 %v5702_v16 }
 0xc7c   : > { %5276 = vmatmul.mubr.msk.f32.gmra.mxu1 %vm738_vm1, %v720_v38 }
 0xc7d   : > { %5289 = vmatprep.mubr.msk.f32.mxu1 %vm5703_vm2, %v5702_v16  ;;  %5288 = vmatpush3.xpose.msk.msra.mxu1 %vm1004_vm3, %v6313_v10 }
 0xc7e   : > { %5299 = vmatprep.subr.mxu1 %v5702_v16 }
 0xd30   : > { %v5249_v2 = vpop.f32.mrf.mxu1 }
 0xd31   : > { %v2581_v26 = vadd.f32 %v5249_v2, %v4879_v11 }
 0xd32   : > { %v2575_v12 = vpop.f32.mrf.mxu1 }
 0xd33   : > { %v6321_v13 = vmul.f32 0.35355338, %v2581_v26  ;;  %v2576_v14 = vadd.f32 %v4879_v11, %v2575_v12 }
 0xd35   : > { %v6323_v15 = vmul.f32 0.35355338, %v2576_v14  ;;  %5290 = vmatmul.mubr.msk.f32.vlgmr.msra.gmra.mxu1 %vm1004_vm3, %v6321_v13 }
 0xd36   : > { %5303 = vmatprep.mubr.msk.f32.mxu1 %vm5703_vm2, %v5702_v16 }
 0xd37   : > { %5283 = vmatmul.mubr.msk.f32.vlgmr.msra.gmra.mxu0 %vm1004_vm3, %v6323_v15 }
 0xd38   : > { %v5274_v18 = vpop.f32.mrf.mxu1  ;;  %5296 = vmatprep.mubr.msk.f32.mxu0 %vm5703_vm2, %v5702_v16 }
 0xd39   : > { %v6334_v8 = vadd.f32 %v5274_v18, %v4897_v17 }
 0xd3a   : > { %v2789_v4 = vpop.f32.mrf.mxu1 }
 0xd3b   : > { %v6336_v19 = vadd.f32 %v4897_v17, %v2789_v4  ;;  %5293 = vmatpush3.msra.mxu0 %v6334_v8 }
 0xd3c   : > { %v5277_v20 = vpop.f32.mrf.mxu1  ;;  %5294 = vmatprep.subr.mxu0 %v5702_v16 }
 0xd3d   : > { %v6340_v21 = vadd.f32 %v5277_v20, %v4897_v17  ;;  %5295 = vmatpush3.msra.mxu0 %v6336_v19 }
 0xd3e   : > { %v2799_v22 = vpop.f32.mrf.mxu1  ;;  %5306 = vmatprep.subr.mxu0 %v5702_v16 }
 0xd3f   : > { %v6344_v24 = vadd.f32 %v4897_v17, %v2799_v22  ;;  %5300 = vmatpush3.msra.mxu1 %v6340_v21 }
 0xd40   : > { %5301 = vmatprep.subr.mxu1 %v5702_v16 }
 0xd41   : > { %5302 = vmatpush3.msra.mxu1 %v6344_v24 }
 0xd42   : > { %5313 = vmatprep.subr.mxu1 %v5702_v16 }
 0xdf5   : > { %v2964_v27 = vpop.f32.mrf.mxu1 }
 0xdf6   : > { %v2971_v29 = vsel %vm2343_vm5, %v2964_v27, -inf }
 0xdf7   : > { %2972 = vmax.xlane.f32.xlu1 %v2971_v29  ;;  %v2885_v30 = vpop.f32.mrf.mxu0  ;;  %v5291_v31 = vpop.f32.mrf.mxu1 }
 0xdf8   : > { %v2968_v32 = vsel %vm2343_vm5, %v2885_v30, -inf }
 0xdf9   : > { %2969 = vmax.xlane.f32.xlu0 %v2968_v32  ;;  %v5284_v33 = vpop.f32.mrf.mxu0 }
 0xe80   : > { %v2973_v34 = vpop.xlane.xlu1 %2972 }
 0xe81   : > { %v2975_v51 = vsub.f32 %v2964_v27, %v2973_v34 }
 0xe82   : > { %v2970_v35 = vpop.xlane.xlu0 %2969 }
 0xe83   : > { %v2978_v36 = vmul.f32 1.442695, %v2975_v51  ;;  %v2974_v37 = vsub.f32 %v2885_v30, %v2970_v35 }
 0xe85   : > { %5530 = vpow2.f32 %v2978_v36  ;;  %v2976_v38 = vmul.f32 1.442695, %v2974_v37 }
 0xe87   : > { %5532 = vpow2.f32 %v2976_v38 }
 0xe92   : > { %v5531_v39 = vpop.eup %5530 }
 0xe93   : > { %v2983_v40 = vsel %vm2343_vm5, %v5531_v39, 0.0 }
 0xe94   : > { %v5533_v41 = vpop.eup %5532  ;;  %2984 = vadd.xlane.f32.xlu1 %v2983_v40 }
 0xe95   : > { %v2980_v42 = vsel %vm2343_vm5, %v5533_v41, 0.0 }
 0xe96   : > { %2981 = vadd.xlane.f32.xlu0 %v2980_v42 }
 0xea5   : > { %3222 = vrot.lane.b32.xlu1 %v6307_v6, %s5704_s0 }
 0xea9   : > { %3138 = vrot.lane.b32.xlu1 %v6302_v1, %s5704_s0 }
 0xeac   : > { %3140 = vrot.lane.b32.xlu0 %v6300_v0, %s5704_s0 }
 0xead   : > { %3220 = vrot.lane.b32.xlu1 %v6313_v10, %s5704_s0 }
 0xeb0   : > { %3136 = vrot.lane.b32.xlu0 %v6323_v15, %s5704_s0 }
 0xeb1   : > { %3218 = vrot.lane.b32.xlu1 %v6321_v13, %s5704_s0 }
 0xf1d   : > { %v2985_v43 = vpop.xlane.xlu1 %2984 }
 0xf1e   : > { %5534 = vrcp.f32 %v2985_v43 }
 0xf1f   : > { %v2982_v44 = vpop.xlane.xlu0 %2981 }
 0xf20   : > { %5536 = vrcp.f32 %v2982_v44 }
 0xf21   : > { %v3223_v45 = vpop.permute.xlu1 %3222 }
 0xf23   : > { %v3141_v52 = vpop.permute.xlu0 %3140 }
 0xf25   : > { %v3139_v53 = vpop.permute.xlu1 %3138 }
 0xf27   : > { %v3137_v55 = vpop.permute.xlu0 %3136 }
 0xf29   : > { %v3221_v50 = vpop.permute.xlu1 %3220 }
 0xf2b   : > { %v5535_v46 = vpop.eup %5534 }
 0xf2c   : > { %v2989_v47 = vmul.f32 %v5535_v46, %v5531_v39 }
 0xf2d   : > { %v5537_v48 = vpop.eup %5536  ;;  %v3219_v54 = vpop.permute.xlu1 %3218 }
 0xf2e   : > { %5304 = vmatmul.mubr.msk.f32.vlgmr.msra.gmra.mxu1 %vm2343_vm5, %v2989_v47  ;;  %v2987_v49 = vmul.f32 %v5537_v48, %v5533_v41 }
 0xf2f   : > { %5314 = vmatpush3.xpose.msk.msra.mxu1 %vm1004_vm3, %v3223_v45  ;;  %5317 = vmatprep.mubr.msk.f32.mxu1 %vm5703_vm2, %v5702_v16 }
 0xf30   : > { %5297 = vmatmul.mubr.msk.f32.vlgmr.msra.gmra.mxu0 %vm2343_vm5, %v2987_v49  ;;  %5315 = vmatprep.subr.mxu1 %v5702_v16 }
 0xf31   : > { %5307 = vmatpush3.xpose.msk.msra.mxu0 %vm1004_vm3, %v3141_v52  ;;  %5310 = vmatprep.mubr.msk.f32.mxu0 %vm5703_vm2, %v5702_v16 }
 0xf32   : > { %5308 = vmatprep.subr.mxu0 %v5702_v16 }
 0xf33   : > { %5316 = vmatpush3.xpose.msk.msra.mxu1 %vm1004_vm3, %v3221_v50 }
 0xf34   : > { %5327 = vmatprep.subr.mxu1 %v5702_v16 }
 0xf35   : > { %5309 = vmatpush3.xpose.msk.msra.mxu0 %vm1004_vm3, %v3139_v53 }
 0xf36   : > { %5318 = vmatmul.mubr.msk.f32.vlgmr.msra.gmra.mxu1 %vm1004_vm3, %v3219_v54  ;;  %5320 = vmatprep.subr.mxu0 %v5702_v16 }
 0xf37   : > { %5331 = vmatprep.mubr.msk.f32.mxu1 %vm5703_vm2, %v5702_v16 }
 0xf38   : > { %5311 = vmatmul.mubr.msk.f32.vlgmr.msra.gmra.mxu0 %vm1004_vm3, %v3137_v55 }
 0xf39   : > { %5324 = vmatprep.mubr.msk.f32.mxu0 %vm5703_vm2, %v5702_v16 }
 0xfee   : > { %v6386_v56 = vpop.f32.mrf.mxu1 }
 0xff0   : > { %v6388_v57 = vpop.f32.mrf.mxu0  ;;  %v5305_v59 = vpop.f32.mrf.mxu1 }
 0xff2   : > { %v5298_v60 = vpop.f32.mrf.mxu0 }
 0xff6   : > { %v3296_v25 = vpop.f32.mrf.mxu1 }
 0xff7   : > { %v3303_v28 = vsel %vm2343_vm5, %v3296_v25, -inf }
 0xff8   : > { %3304 = vmax.xlane.f32.xlu1 %v3303_v28  ;;  %v3214_v61 = vpop.f32.mrf.mxu0  ;;  %v5319_v62 = vpop.f32.mrf.mxu1 }
 0xff9   : > { %v3300_v5 = vsel %vm2343_vm5, %v3214_v61, -inf }
 0xffa   : > { %3301 = vmax.xlane.f32.xlu0 %v3300_v5  ;;  %v5312_v9 = vpop.f32.mrf.mxu0 }
0x1009   : > { %3407 = vrot.lane.b32.xlu1 %v6340_v21, %s5704_s0 }
0x100d   : > { %3324 = vrot.lane.b32.xlu1 %v6336_v19, %s5704_s0 }
0x1010   : > { %3326 = vrot.lane.b32.xlu0 %v6334_v8, %s5704_s0 }
0x1011   : > { %3405 = vrot.lane.b32.xlu1 %v6344_v24, %s5704_s0  ;;  %s6664_s0 = smov 24  }
0x1014   : > { %3488 = vrot.lane.b32.xlu0 %v6300_v0, %s5705_s24 }
0x1015   : > { %3570 = vrot.lane.b32.xlu1 %v6307_v6, %s5705_s24 }
0x1019   : > { %3568 = vrot.lane.b32.xlu1 %v6313_v10, %s5705_s24 }
0x101d   : > { %3566 = vrot.lane.b32.xlu1 %v6321_v13, %s5705_s24 }
0x1081   : > { %v3305_v63 = vpop.xlane.xlu1 %3304 }
0x1082   : > { %v3307_v3 = vsub.f32 %v3296_v25, %v3305_v63 }
0x1083   : > { %v3302_v7 = vpop.xlane.xlu0 %3301 }
0x1084   : > { %v3310_v11 = vmul.f32 1.442695, %v3307_v3  ;;  %v3306_v2 = vsub.f32 %v3214_v61, %v3302_v7 }
0x1085   : > { %v3408_v26 = vpop.permute.xlu1 %3407 }
0x1086   : > { %5538 = vpow2.f32 %v3310_v11  ;;  %v3308_v12 = vmul.f32 1.442695, %v3306_v2  ;;  %5328 = vmatpush3.msra.mxu1 %v3408_v26 }
0x1087   : > { %v3327_v14 = vpop.permute.xlu0 %3326  ;;  %5329 = vmatprep.subr.mxu1 %v5702_v16 }
0x1088   : > { %5540 = vpow2.f32 %v3308_v12  ;;  %5321 = vmatpush3.msra.mxu0 %v3327_v14 }
0x1089   : > { %v3325_v17 = vpop.permute.xlu1 %3324  ;;  %5322 = vmatprep.subr.mxu0 %v5702_v16 }
0x108a   : > { %5323 = vmatpush3.msra.mxu0 %v3325_v17 }
0x108b   : > { %5334 = vmatprep.subr.mxu0 %v5702_v16  ;;  %v3489_v29 = vpop.permute.xlu0 %3488 }
0x108d   : > { %v3406_v18 = vpop.permute.xlu1 %3405 }
0x108e   : > { %5330 = vmatpush3.msra.mxu1 %v3406_v18 }
0x108f   : > { %5341 = vmatprep.subr.mxu1 %v5702_v16 }
0x1091   : > { %v3571_v32 = vpop.permute.xlu1 %3570 }
0x1093   : > { %v5539_v4 = vpop.eup %5538 }
0x1094   : > { %v3315_v20 = vsel %vm2343_vm5, %v5539_v4, 0.0 }
0x1095   : > { %v5541_v22 = vpop.eup %5540  ;;  %3316 = vadd.xlane.f32.xlu0 %v3315_v20  ;;  %v3569_v35 = vpop.permute.xlu1 %3568 }
0x1096   : > { %v3312_v27 = vsel %vm2343_vm5, %v5541_v22, 0.0 }
0x1099   : > { %3313 = vadd.xlane.f32.xlu0 %v3312_v27  ;;  %v3567_v38 = vpop.permute.xlu1 %3566 }
0x10af   : > { %3486 = vrot.lane.b32.xlu0 %v6302_v1, %s5705_s24 }
0x10b3   : > { %3484 = vrot.lane.b32.xlu0 %v6323_v15, %s5705_s24 }
0x111e   : > { %v3317_v30 = vpop.xlane.xlu0 %3316 }
0x111f   : > { %5542 = vrcp.f32 %v3317_v30 }
0x1122   : > { %v3314_v31 = vpop.xlane.xlu0 %3313 }
0x1123   : > { %5544 = vrcp.f32 %v3314_v31 }
0x1126   : > { %v3487_v37 = vpop.permute.xlu0 %3486 }
0x112a   : > { %v3485_v39 = vpop.permute.xlu0 %3484 }
0x112c   : > { %v5543_v33 = vpop.eup %5542 }
0x112d   : > { %v3321_v34 = vmul.f32 %v5543_v33, %v5539_v4 }
0x112f   : > { %5332 = vmatmul.mubr.msk.f32.vlgmr.msra.gmra.mxu1 %vm2343_vm5, %v3321_v34 }
0x1130   : > { %v5545_v51 = vpop.eup %5544  ;;  %5342 = vmatpush3.xpose.msk.msra.mxu1 %vm1004_vm3, %v3571_v32  ;;  %5345 = vmatprep.mubr.msk.f32.mxu1 %vm5703_vm2, %v5702_v16 }
0x1131   : > { %5343 = vmatprep.subr.mxu1 %v5702_v16  ;;  %v3319_v36 = vmul.f32 %v5545_v51, %v5541_v22 }
0x1133   : > { %5325 = vmatmul.mubr.msk.f32.vlgmr.msra.gmra.mxu0 %vm2343_vm5, %v3319_v36 }
0x1134   : > { %5335 = vmatpush3.xpose.msk.msra.mxu0 %vm1004_vm3, %v3489_v29  ;;  %5344 = vmatpush3.xpose.msk.msra.mxu1 %vm1004_vm3, %v3569_v35 }
0x1135   : > { %5336 = vmatprep.subr.mxu0 %v5702_v16  ;;  %5338 = vmatprep.mubr.msk.f32.mxu0 %vm5703_vm2, %v5702_v16 }
0x1136   : > { %5355 = vmatprep.subr.mxu1 %v5702_v16 }
0x1137   : > { %5346 = vmatmul.mubr.msk.f32.vlgmr.msra.gmra.mxu1 %vm1004_vm3, %v3567_v38 }
0x1138   : > { %5337 = vmatpush3.xpose.msk.msra.mxu0 %vm1004_vm3, %v3487_v37  ;;  %5359 = vmatprep.mubr.msk.f32.mxu1 %vm5703_vm2, %v5702_v16 }
0x1139   : > { %5348 = vmatprep.subr.mxu0 %v5702_v16 }
0x113b   : > { %5339 = vmatmul.mubr.msk.f32.vlgmr.msra.gmra.mxu0 %vm1004_vm3, %v3485_v39 }
0x113c   : > { %5352 = vmatprep.mubr.msk.f32.mxu0 %vm5703_vm2, %v5702_v16 }
0x11ef   : > { %v6438_v40 = vpop.f32.mrf.mxu1 }
0x11f1   : > { %v5333_v41 = vpop.f32.mrf.mxu1 }
0x11f3   : > { %v6440_v42 = vpop.f32.mrf.mxu0 }
0x11f5   : > { %v5326_v43 = vpop.f32.mrf.mxu0 }
0x11f7   : > { %v3644_v44 = vpop.f32.mrf.mxu1 }
0x11f8   : > { %v3651_v45 = vsel %vm2343_vm5, %v3644_v44, -inf }
0x11f9   : > { %3652 = vmax.xlane.f32.xlu1 %v3651_v45  ;;  %v5347_v53 = vpop.f32.mrf.mxu1 }
0x11fb   : > { %v3562_v46 = vpop.f32.mrf.mxu0 }
0x11fc   : > { %v3648_v47 = vsel %vm2343_vm5, %v3562_v46, -inf }
0x11fd   : > { %3649 = vmax.xlane.f32.xlu0 %v3648_v47  ;;  %v5340_v48 = vpop.f32.mrf.mxu0  ;;  %v4936_v47 = vld [vmem:[%s5941_s27 + $0x70] sm:$0xff] }
0x11fe   : > { %v4935_v48 = vld [vmem:[%s5941_s27 + $0x68] sm:$0xff] }
0x120a   : > { %3751 = vrot.lane.b32.xlu1 %v6340_v21, %s5705_s24 }
0x120e   : > { %3670 = vrot.lane.b32.xlu1 %v6336_v19, %s5705_s24 }
0x1212   : > { %3749 = vrot.lane.b32.xlu1 %v6344_v24, %s5705_s24 }
0x1213   : > { %3672 = vrot.lane.b32.xlu0 %v6334_v8, %s5705_s24 }
0x1216   : > { %3914 = vrot.lane.b32.xlu1 %v6307_v6, %s5706_s3 }
0x1217   : > { %3832 = vrot.lane.b32.xlu0 %v6300_v0, %s5706_s3 }
0x121a   : > { %3912 = vrot.lane.b32.xlu1 %v6313_v10, %s5706_s3 }
0x121e   : > { %3910 = vrot.lane.b32.xlu1 %v6321_v13, %s5706_s3 }
0x1282   : > { %v3653_v49 = vpop.xlane.xlu1 %3652 }
0x1283   : > { %v3655_v50 = vsub.f32 %v3644_v44, %v3653_v49 }
0x1285   : > { %v3658_v52 = vmul.f32 1.442695, %v3655_v50 }
0x1286   : > { %v3752_v54 = vpop.permute.xlu1 %3751  ;;  %v3650_v55 = vpop.xlane.xlu0 %3649 }
0x1287   : > { %5546 = vpow2.f32 %v3658_v52  ;;  %v3654_v59 = vsub.f32 %v3562_v46, %v3650_v55  ;;  %5356 = vmatpush3.msra.mxu1 %v3752_v54  ;;  %v4937_v46 = vld [vmem:[%s5941_s27 + $0x78] sm:$0xff] }
0x1288   : > { %5357 = vmatprep.subr.mxu1 %v5702_v16 }
0x1289   : > { %v3656_v6 = vmul.f32 1.442695, %v3654_v59 }
0x128a   : > { %v3671_v60 = vpop.permute.xlu1 %3670  ;;  %v3673_v25 = vpop.permute.xlu0 %3672 }
0x128b   : > { %5548 = vpow2.f32 %v3656_v6  ;;  %5349 = vmatpush3.msra.mxu0 %v3673_v25 }
0x128c   : > { %5350 = vmatprep.subr.mxu0 %v5702_v16 }
0x128d   : > { %5351 = vmatpush3.msra.mxu0 %v3671_v60 }
0x128e   : > { %v3750_v0 = vpop.permute.xlu1 %3749  ;;  %5362 = vmatprep.subr.mxu0 %v5702_v16  ;;  %v3833_v62 = vpop.permute.xlu0 %3832 }
0x128f   : > { %5358 = vmatpush3.msra.mxu1 %v3750_v0 }
0x1290   : > { %5369 = vmatprep.subr.mxu1 %v5702_v16 }
0x1292   : > { %v3915_v63 = vpop.permute.xlu1 %3914 }
0x1294   : > { %v5547_v10 = vpop.eup %5546 }
0x1295   : > { %v3663_v13 = vsel %vm2343_vm5, %v5547_v10, 0.0 }
0x1296   : > { %3664 = vadd.xlane.f32.xlu0 %v3663_v13  ;;  %v3913_v2 = vpop.permute.xlu1 %3912 }
0x1298   : > { %v5549_v28 = vpop.eup %5548 }
0x1299   : > { %v3660_v61 = vsel %vm2343_vm5, %v5549_v28, 0.0 }
0x129a   : > { %3661 = vadd.xlane.f32.xlu0 %v3660_v61  ;;  %v3911_v26 = vpop.permute.xlu1 %3910 }
0x12b0   : > { %3830 = vrot.lane.b32.xlu0 %v6302_v1, %s5706_s3 }
0x12b4   : > { %3828 = vrot.lane.b32.xlu0 %v6323_v15, %s5706_s3 }
0x131f   : > { %v3665_v5 = vpop.xlane.xlu0 %3664 }
0x1320   : > { %5550 = vrcp.f32 %v3665_v5 }
0x1323   : > { %v3662_v9 = vpop.xlane.xlu0 %3661 }
0x1324   : > { %5552 = vrcp.f32 %v3662_v9  ;;  %v4939_v9 = vld [vmem:[%s5961_s15 + $0x3] ss:$0 sm:$0xff] }
0x1327   : > { %v3831_v15 = vpop.permute.xlu0 %3830 }
0x132b   : > { %v3829_v12 = vpop.permute.xlu0 %3828 }
0x132d   : > { %v5551_v3 = vpop.eup %5550 }
0x132e   : > { %v3669_v7 = vmul.f32 %v5551_v3, %v5547_v10 }
0x1330   : > { %5360 = vmatmul.mubr.msk.f32.vlgmr.msra.gmra.mxu1 %vm2343_vm5, %v3669_v7 }
0x1331   : > { %v5553_v11 = vpop.eup %5552  ;;  %5370 = vmatpush3.xpose.msk.msra.mxu1 %vm1004_vm3, %v3915_v63  ;;  %5373 = vmatprep.mubr.msk.f32.mxu1 %vm5703_vm2, %v5702_v16 }
0x1332   : > { %5371 = vmatprep.subr.mxu1 %v5702_v16  ;;  %v3667_v1 = vmul.f32 %v5553_v11, %v5549_v28 }
0x1334   : > { %5353 = vmatmul.mubr.msk.f32.vlgmr.msra.gmra.mxu0 %vm2343_vm5, %v3667_v1 }
0x1335   : > { %5363 = vmatpush3.xpose.msk.msra.mxu0 %vm1004_vm3, %v3833_v62  ;;  %5372 = vmatpush3.xpose.msk.msra.mxu1 %vm1004_vm3, %v3913_v2 }
0x1336   : > { %5364 = vmatprep.subr.mxu0 %v5702_v16  ;;  %5366 = vmatprep.mubr.msk.f32.mxu0 %vm5703_vm2, %v5702_v16 }
0x1337   : > { %5383 = vmatprep.subr.mxu1 %v5702_v16 }
0x1338   : > { %5374 = vmatmul.mubr.msk.f32.vlgmr.msra.gmra.mxu1 %vm1004_vm3, %v3911_v26 }
0x1339   : > { %5365 = vmatpush3.xpose.msk.msra.mxu0 %vm1004_vm3, %v3831_v15  ;;  %5387 = vmatprep.mubr.msk.f32.mxu1 %vm5703_vm2, %v5702_v16 }
0x133a   : > { %5376 = vmatprep.subr.mxu0 %v5702_v16 }
0x133c   : > { %5367 = vmatmul.mubr.msk.f32.vlgmr.msra.gmra.mxu0 %vm1004_vm3, %v3829_v12 }
0x133d   : > { %5380 = vmatprep.mubr.msk.f32.mxu0 %vm5703_vm2, %v5702_v16 }
0x13f0   : > { %v3824_v14 = vpop.f32.mrf.mxu1 }
0x13f2   : > { %v5361_v17 = vpop.f32.mrf.mxu1 }
0x13f4   : > { %v3745_v18 = vpop.f32.mrf.mxu0 }
0x13f6   : > { %v5354_v4 = vpop.f32.mrf.mxu0 }
0x13f8   : > { %v3988_v20 = vpop.f32.mrf.mxu1 }
0x13f9   : > { %v3995_v22 = vsel %vm2343_vm5, %v3988_v20, -inf }
0x13fa   : > { %3996 = vmax.xlane.f32.xlu1 %v3995_v22  ;;  %v5375_v27 = vpop.f32.mrf.mxu1  ;;  %v4347_v22 = vld [vmem:[%s5966_s28 + $0x18] sm:$0xff] }
0x13fb   : > { %v4346_v27 = vld [vmem:[%s5966_s28 + $0x10] sm:$0xff] }
0x13fc   : > { %v3906_v29 = vpop.f32.mrf.mxu0 }
0x13fd   : > { %v3992_v30 = vsel %vm2343_vm5, %v3906_v29, -inf }
0x13fe   : > { %3993 = vmax.xlane.f32.xlu0 %v3992_v30  ;;  %v5368_v31 = vpop.f32.mrf.mxu0  ;;  %v4344_v30 = vld [vmem:[%s5966_s28] sm:$0xff] }
0x13ff   : > { %v4445_v31 = vld [vmem:[%s5980_s30 + $0x38] sm:$0xff] }
0x140b   : > { %4095 = vrot.lane.b32.xlu1 %v6340_v21, %s5706_s3 }
0x140f   : > { %4014 = vrot.lane.b32.xlu1 %v6336_v19, %s5706_s3 }
0x1413   : > { %4093 = vrot.lane.b32.xlu1 %v6344_v24, %s5706_s3 }
0x1417   : > { %4176 = vrot.lane.b32.xlu1 %v6438_v40, %s5707_s22 }
0x141b   : > { %4184 = vrot.lane.b32.xlu1 %v3824_v14, %s5708_s23 }
0x1483   : > { %v3997_v32 = vpop.xlane.xlu1 %3996 }
0x1484   : > { %v3999_v33 = vsub.f32 %v3988_v20, %v3997_v32  ;;  %v4444_v32 = vld [vmem:[%s5980_s30 + $0x30] sm:$0xff] }
0x1486   : > { %v4002_v34 = vmul.f32 1.442695, %v3999_v33  ;;  %v4443_v33 = vld [vmem:[%s5980_s30 + $0x28] sm:$0xff] }
0x1487   : > { %v4096_v51 = vpop.permute.xlu1 %4095  ;;  %v3994_v35 = vpop.xlane.xlu0 %3993 }
0x1488   : > { %5554 = vpow2.f32 %v4002_v34  ;;  %v3998_v36 = vsub.f32 %v3906_v29, %v3994_v35  ;;  %5384 = vmatpush3.msra.mxu1 %v4096_v51  ;;  %v4345_v29 = vld [vmem:[%s5966_s28 + $0x8] sm:$0xff]  ;;  %v4442_v34 = vld [vmem:[%s5980_s30 + $0x20] sm:$0xff]  ;;  %s6665_s28 = scalar_lea.vmem %s6617_s9, %s5949_s14 }
0x1489   : > { %5385 = vmatprep.subr.mxu1 %v5702_v16 }
0x148a   : > { %v4000_v21 = vmul.f32 1.442695, %v3998_v36 }
0x148b   : > { %v4015_v19 = vpop.permute.xlu1 %4014 }
0x148c   : > { %5556 = vpow2.f32 %v4000_v21 }
0x148f   : > { %v4094_v37 = vpop.permute.xlu1 %4093 }
0x1490   : > { %5386 = vmatpush3.msra.mxu1 %v4094_v37 }
0x1491   : > { %5401 = vmatprep.subr.mxu1 %v4347_v22 }
0x1493   : > { %v4177_v55 = vpop.permute.xlu1 %4176 }
0x1494   : > { %v4197_v10 = vsel %vm1004_vm3, %v6386_v56, %v4177_v55 }
0x1495   : > { %v5555_v24 = vpop.eup %5554 }
0x1496   : > { %v4007_v38 = vsel %vm2343_vm5, %v5555_v24, 0.0 }
0x1497   : > { %4008 = vadd.xlane.f32.xlu0 %v4007_v38  ;;  %v4185_v6 = vpop.permute.xlu1 %4184  ;;  %v4944_v38 = vld [vmem:[%s5986_s17 + $0x1] ss:$0 sm:$0xff] }
0x1498   : > { %v4199_v61 = vsel %vm2343_vm5, %v4197_v10, %v4185_v6 }
0x1499   : > { %v5557_v39 = vpop.eup %5556 }
0x149a   : > { %v4004_v40 = vsel %vm2343_vm5, %v5557_v39, 0.0 }
0x149b   : > { %4005 = vadd.xlane.f32.xlu0 %v4004_v40  ;;  %v4945_v40 = vld [vmem:[%s5991_s16 + $0x1] ss:$0 sm:$0xff] }
0x14b1   : > { %4016 = vrot.lane.b32.xlu0 %v6334_v8, %s5706_s3 }
0x14b5   : > { %4174 = vrot.lane.b32.xlu0 %v6440_v42, %s5707_s22 }
0x14b9   : > { %4182 = vrot.lane.b32.xlu0 %v3745_v18, %s5708_s23 }
0x1520   : > { %v4009_v41 = vpop.xlane.xlu0 %4008 }
0x1521   : > { %5558 = vrcp.f32 %v4009_v41 }
0x1524   : > { %v4006_v43 = vpop.xlane.xlu0 %4005 }
0x1525   : > { %5560 = vrcp.f32 %v4006_v43 }
0x1528   : > { %v4017_v44 = vpop.permute.xlu0 %4016 }
0x1529   : > { %5377 = vmatpush3.msra.mxu0 %v4017_v44 }
0x152a   : > { %5378 = vmatprep.subr.mxu0 %v5702_v16  ;;  %v4934_v16 = vld [vmem:[%s5941_s27 + $0x60] sm:$0xff] }
0x152b   : > { %5379 = vmatpush3.msra.mxu0 %v4015_v19 }
0x152c   : > { %5390 = vmatprep.subr.mxu0 %v4937_v46  ;;  %v4175_v59 = vpop.permute.xlu0 %4174 }
0x152d   : > { %v4196_v25 = vsel %vm1004_vm3, %v6388_v57, %v4175_v59 }
0x152e   : > { %v5559_v45 = vpop.eup %5558 }
0x152f   : > { %v4013_v8 = vmul.f32 %v5559_v45, %v5555_v24 }
0x1530   : > { %v4183_v60 = vpop.permute.xlu0 %4182 }
0x1531   : > { %5388 = vmatmul.mubr.msk.f32.vlgmr.msra.gmra.mxu1 %vm2343_vm5, %v4013_v8  ;;  %v4198_v13 = vsel %vm2343_vm5, %v4196_v25, %v4183_v60 }
0x1532   : > { %v5561_v42 = vpop.eup %5560  ;;  %5402 = vmatpush3.msra.mxu1 %v4347_v22  ;;  %v4955_v22 = vld [vmem:[%s5991_s16 + $0x2] ss:$0 sm:$0xff]  ;;  %s6667_s16 = sld [smem:[#allocation21_spill]] (!%p4956_p1) }
0x1533   : > { %v4011_v53 = vmul.f32 %v5561_v42, %v5557_v39  ;;  %5403 = vmatprep.subr.mxu1 %v4346_v27 }
0x1534   : > { %5404 = vmatpush3.msra.mxu1 %v4346_v27 }
0x1535   : > { %5381 = vmatmul.mubr.msk.f32.vlgmr.msra.gmra.mxu0 %vm2343_vm5, %v4011_v53  ;;  %5405 = vmatprep.subr.mxu1 %v4345_v29  ;;  %v4441_v53 = vld [vmem:[%s5980_s30 + $0x18] sm:$0xff] }
0x1536   : > { %5391 = vmatpush3.msra.mxu0 %v4937_v46  ;;  %5406 = vmatpush3.msra.mxu1 %v4345_v29  ;;  %v4440_v46 = vld [vmem:[%s5980_s30 + $0x10] sm:$0xff] }
0x1537   : > { %5392 = vmatprep.subr.mxu0 %v4936_v47  ;;  %5407 = vmatprep.subr.mxu1 %v4344_v30 }
0x1538   : > { %5393 = vmatpush3.msra.mxu0 %v4936_v47  ;;  %5408 = vmatpush3.msra.mxu1 %v4344_v30  ;;  %v4439_v47 = vld [vmem:[%s5980_s30 + $0x8] sm:$0xff] }
0x1539   : > { %5394 = vmatprep.subr.mxu0 %v4935_v48 }
0x153a   : > { %5395 = vmatpush3.msra.mxu0 %v4935_v48  ;;  %v4438_v48 = vld [vmem:[%s5980_s30] sm:$0xff]  ;;  %s6666_s30 = scalar_lea.vmem %s6619_s11, %s5949_s14 }
0x153b   : > { %5396 = vmatprep.subr.mxu0 %v4934_v16  ;;  %v4949_v6 = vld [vmem:[%s6666_s30] ss:$0 sm:$0xff] }
0x153c   : > { %5397 = vmatpush3.msra.mxu0 %v4934_v16  ;;  %v4946_v16 = vld [vmem:[%s6665_s28] ss:$0 sm:$0xff] }
0x153d   : > { %5412 = vmatprep.subr.mxu0 %v4445_v31 }
0x15f1   : > { %v4168_v49 = vpop.f32.mrf.mxu1 }
0x15f2   : > { %4192 = vrot.lane.b32.xlu1 %v4168_v49, %s6664_s0 }
0x15f3   : > { %v5389_v50 = vpop.f32.mrf.mxu1 }
0x15f5   : > { %v4089_v52 = vpop.f32.mrf.mxu0 }
0x15f6   : > { %4190 = vrot.lane.b32.xlu0 %v4089_v52, %s6664_s0 }
0x15f7   : > { %v5382_v54 = vpop.f32.mrf.mxu0 }
0x1664   : > { %v4193_v0 = vpop.permute.xlu1 %4192 }
0x1665   : > { %v4201_v5 = vsel %vm2346_vm4, %v4199_v61, %v4193_v0 }
0x1668   : > { %v4191_v28 = vpop.permute.xlu0 %4190 }
0x1669   : > { %v4200_v62 = vsel %vm2346_vm4, %v4198_v13, %v4191_v28 }
0x166a   : > { %5398 = vmatprep.mubr.msk.f32.mxu0 %vm738_vm1, %v4200_v62 }
0x166b   : > { %5399 = vmatmul.mubr.msk.f32.vlgmr.msra.gmra.mxu0 %vm738_vm1, %v4201_v5 }
0x166c   : > { %5413 = vmatpush3.msra.mxu0 %v4445_v31 }
0x166d   : > { %5414 = vmatprep.subr.mxu0 %v4444_v32 }
0x166e   : > { %5415 = vmatpush3.msra.mxu0 %v4444_v32 }
0x166f   : > { %5416 = vmatprep.subr.mxu0 %v4443_v33 }
0x1670   : > { %5417 = vmatpush3.msra.mxu0 %v4443_v33 }
0x1671   : > { %5418 = vmatprep.subr.mxu0 %v4442_v34 }
0x1672   : > { %5419 = vmatpush3.msra.mxu0 %v4442_v34 }
0x1673   : > { %5420 = vmatprep.subr.mxu0 %v4441_v53 }
0x1674   : > { %5421 = vmatpush3.msra.mxu0 %v4441_v53 }
0x1675   : > { %5422 = vmatprep.subr.mxu0 %v4440_v46 }
0x1676   : > { %5423 = vmatpush3.msra.mxu0 %v4440_v46 }
0x1677   : > { %5424 = vmatprep.subr.mxu0 %v4439_v47 }
0x1678   : > { %5425 = vmatpush3.msra.mxu0 %v4439_v47 }
0x1679   : > { %5426 = vmatprep.subr.mxu0 %v4438_v48 }
0x167a   : > { %5427 = vmatpush3.msra.mxu0 %v4438_v48 }
0x172b   : > { %v5400_v63 = vpop.f32.mrf.mxu0 }
0x172c   : > { %v4293_v57 = vadd.f32 %v5400_v63, %v4939_v9 }
0x172d   : > { %v4287_v3 = vpop.f32.mrf.mxu0 }
0x172e   : > { %v4297_v7 = vadd.f32 %v4293_v57, %v6280_v23  ;;  %v4288_v56 = vadd.f32 %v4939_v9, %v4287_v3 }
0x1730   : > { %v4305_v11 = vsel %vm738_vm1, %v4297_v7, 0.0  ;;  %v4296_v2 = vadd.f32 %v4288_v56, %v6276_v58 }
0x1731   : > { %4306 = vadd.xlane.f32.xlu1 %v4305_v11 }
0x1732   : > { %v4302_v1 = vsel %vm738_vm1, %v4296_v2, 0.0 }
0x1733   : > { %4303 = vadd.xlane.f32.xlu0 %v4302_v1 }
0x17ba   : > { %v4307_v15 = vpop.xlane.xlu1 %4306 }
0x17bb   : > { %v4309_v26 = vmul.f32 0.03125, %v4307_v15 }
0x17bc   : > { %v4304_v12 = vpop.xlane.xlu0 %4303 }
0x17bd   : > { %v4308_v14 = vmul.f32 0.03125, %v4304_v12  ;;  %v4311_v17 = vsub.f32 %v4297_v7, %v4309_v26 }
0x17bf   : > { %v4310_v18 = vsub.f32 %v4296_v2, %v4308_v14  ;;  %v4313_v20 = vmul.f32 %v4311_v17, %v4311_v17 }
0x17c1   : > { %v4312_v23 = vmul.f32 %v4310_v18, %v4310_v18  ;;  %v4317_v58 = vsel %vm738_vm1, %v4313_v20, 0.0 }
0x17c3   : > { %v4314_v4 = vsel %vm738_vm1, %v4312_v23, 0.0 }
0x17c4   : > { %4315 = vadd.xlane.f32.xlu0 %v4314_v4  ;;  %v4954_v4 = vld [vmem:[%s5986_s17 + $0x2] ss:$0 sm:$0xff] }
0x17c8   : > { %4318 = vadd.xlane.f32.xlu0 %v4317_v58 }
0x184d   : > { %v4316_v51 = vpop.xlane.xlu0 %4315 }
0x184e   : > { %v4320_v35 = vmul.f32 0.03125, %v4316_v51 }
0x1850   : > { %v4322_v36 = vadd.f32 1e-05, %v4320_v35 }
0x1851   : > { %v4319_v21 = vpop.xlane.xlu0 %4318 }
0x1852   : > { %5562 = vrsqrt.f32 %v4322_v36  ;;  %v4321_v19 = vmul.f32 0.03125, %v4319_v21 }
0x1854   : > { %v4323_v37 = vadd.f32 1e-05, %v4321_v19 }
0x1856   : > { %5564 = vrsqrt.f32 %v4323_v37 }
0x185f   : > { %v5563_v24 = vpop.eup %5562 }
0x1860   : > { %v4326_v39 = vmul.f32 %v5563_v24, %v4310_v18 }
0x1862   : > { %v4334_v41 = vmul.f32 %v4944_v38, %v4326_v39 }
0x1863   : > { %v5565_v43 = vpop.eup %5564 }
0x1864   : > { %v4327_v44 = vmul.f32 %v5565_v43, %v4311_v17  ;;  %v4342_v45 = vadd.f32 %v4945_v40, %v4334_v41 }
0x1866   : > { %v4335_v8 = vmul.f32 %v4944_v38, %v4327_v44  ;;  %5409 = vmatprep.mubr.msk.f32.mxu1 %vm738_vm1, %v4342_v45 }
0x1868   : > { %v4343_v42 = vadd.f32 %v4945_v40, %v4335_v8 }
0x186a   : > { %5410 = vmatmul.mubr.msk.f32.vlgmr.msra.gmra.mxu1 %vm738_vm1, %v4343_v42 }
0x192a   : > { %v5411_v49 = vpop.f32.mrf.mxu1 }
0x192b   : > { %v4433_v50 = vadd.f32 %v5411_v49, %v4946_v16 }
0x192c   : > { %v4427_v52 = vpop.f32.mrf.mxu1 }
0x192d   : > { %v4428_v54 = vadd.f32 %v4946_v16, %v4427_v52  ;;  %v4437_v59 = vmax.f32 %v4433_v50, 0.0 }
0x192f   : > { %v4436_v55 = vmax.f32 %v4428_v54, 0.0 }
0x1931   : > { %5428 = vmatprep.mubr.msk.f32.mxu0 %vm4453_vm6, %v4436_v55 }
0x1932   : > { %5429 = vmatmul.mubr.msk.f32.vlgmr.msra.gmra.mxu0 %vm4453_vm6, %v4437_v59 }
0x19f2   : > { %v5430_v60 = vpop.f32.mrf.mxu0 }
0x19f3   : > { %v4532_v25 = vadd.f32 %v5430_v60, %v4949_v6 }
0x19f4   : > { %v4526_v0 = vpop.f32.mrf.mxu0 }
0x19f5   : > { %v4536_v10 = vadd.f32 %v4532_v25, %v4343_v42  ;;  %v4527_v13 = vadd.f32 %v4949_v6, %v4526_v0 }
0x19f7   : > { %v4535_v28 = vadd.f32 %v4527_v13, %v4342_v45  ;;  %v4544_v61 = vsel %vm738_vm1, %v4536_v10, 0.0 }
0x19f8   : > { %4545 = vadd.xlane.f32.xlu1 %v4544_v61 }
0x19f9   : > { %v4541_v62 = vsel %vm738_vm1, %v4535_v28, 0.0 }
0x19fa   : > { %4542 = vadd.xlane.f32.xlu0 %v4541_v62 }
0x1a81   : > { %v4546_v5 = vpop.xlane.xlu1 %4545 }
0x1a82   : > { %v4548_v9 = vmul.f32 0.03125, %v4546_v5 }
0x1a83   : > { %v4543_v63 = vpop.xlane.xlu0 %4542 }
0x1a84   : > { %v4550_v57 = vsub.f32 %v4536_v10, %v4548_v9  ;;  %v4547_v3 = vmul.f32 0.03125, %v4543_v63 }
0x1a86   : > { %v4549_v7 = vsub.f32 %v4535_v28, %v4547_v3  ;;  %v4552_v56 = vmul.f32 %v4550_v57, %v4550_v57 }
0x1a88   : > { %v4556_v11 = vsel %vm738_vm1, %v4552_v56, 0.0  ;;  %v4551_v2 = vmul.f32 %v4549_v7, %v4549_v7 }
0x1a89   : > { %4557 = vadd.xlane.f32.xlu1 %v4556_v11 }
0x1a8a   : > { %v4553_v1 = vsel %vm738_vm1, %v4551_v2, 0.0 }
0x1a8b   : > { %4554 = vadd.xlane.f32.xlu0 %v4553_v1 }
0x1b12   : > { %v4558_v15 = vpop.xlane.xlu1 %4557 }
0x1b13   : > { %v4560_v26 = vmul.f32 0.03125, %v4558_v15 }
0x1b14   : > { %v4555_v12 = vpop.xlane.xlu0 %4554 }
0x1b15   : > { %v4562_v14 = vadd.f32 1e-05, %v4560_v26  ;;  %v4559_v17 = vmul.f32 0.03125, %v4555_v12 }
0x1b17   : > { %5566 = vrsqrt.f32 %v4562_v14  ;;  %v4561_v18 = vadd.f32 1e-05, %v4559_v17 }
0x1b19   : > { %5568 = vrsqrt.f32 %v4561_v18 }
0x1b24   : > { %v5567_v23 = vpop.eup %5566 }
0x1b25   : > { %v4566_v20 = vmul.f32 %v5567_v23, %v4550_v57 }
0x1b26   : > { %v5569_v58 = vpop.eup %5568 }
0x1b27   : > { %v4574_v27 = vmul.f32 %v4954_v4, %v4566_v20  ;;  %v4565_v29 = vmul.f32 %v5569_v58, %v4549_v7 }
0x1b29   : > { %v4582_v30 = vadd.f32 %v4955_v22, %v4574_v27  ;;  %v4573_v31 = vmul.f32 %v4954_v4, %v4565_v29  ;;  %4588 = sbr.rel (%p4956_p1) target bundleno = 7271 (0x1c67), region = 100 }
0x1b2b   : > { %4584 = vst.msk [vmem:[#allocation7 + $0x8] sm:$0xff] %vm738_vm1, %v4582_v30  ;;  %v4581_v32 = vadd.f32 %v4955_v22, %v4573_v31 }
0x1b2d   : > { %4583 = vst.msk [vmem:[#allocation7] sm:$0xff] %vm738_vm1, %v4581_v32 }
0x1b2e   : > { %v4591_v33 = vsel %vm738_vm1, %v4581_v32, 0.0  ;;  %v4594_v34 = vsel %vm738_vm1, %v4582_v30, 0.0  ;;  %v4957_v46 = vld [vmem:[%s6667_s16] ss:$0 sm:$0xff] }
0x1b2f   : > { %4592 = vadd.xlane.f32.xlu0 %v4591_v33  ;;  %v4958_v48 = vld [vmem:[%s6668_s21] ss:$0 sm:$0xff] }
0x1b33   : > { %4595 = vadd.xlane.f32.xlu0 %v4594_v34 }
0x1bb8   : > { %v4593_v51 = vpop.xlane.xlu0 %4592 }
0x1bb9   : > { %v4597_v35 = vmul.f32 0.03125, %v4593_v51 }
0x1bbb   : > { %v4599_v36 = vsub.f32 %v4581_v32, %v4597_v35 }
0x1bbc   : > { %v4596_v21 = vpop.xlane.xlu0 %4595 }
0x1bbd   : > { %v4598_v19 = vmul.f32 0.03125, %v4596_v21  ;;  %v4601_v37 = vmul.f32 %v4599_v36, %v4599_v36 }
0x1bbf   : > { %v4600_v24 = vsub.f32 %v4582_v30, %v4598_v19  ;;  %v4603_v38 = vsel %vm738_vm1, %v4601_v37, 0.0 }
0x1bc0   : > { %4604 = vadd.xlane.f32.xlu1 %v4603_v38 }
0x1bc1   : > { %v4602_v39 = vmul.f32 %v4600_v24, %v4600_v24 }
0x1bc3   : > { %v4606_v40 = vsel %vm738_vm1, %v4602_v39, 0.0 }
0x1bc4   : > { %4607 = vadd.xlane.f32.xlu1 %v4606_v40 }
0x1c49   : > { %v4605_v41 = vpop.xlane.xlu1 %4604 }
0x1c4a   : > { %v4609_v43 = vmul.f32 0.03125, %v4605_v41 }
0x1c4c   : > { %v4611_v44 = vadd.f32 1e-05, %v4609_v43 }
0x1c4d   : > { %v4608_v45 = vpop.xlane.xlu1 %4607 }
0x1c4e   : > { %5570 = vrsqrt.f32 %v4611_v44  ;;  %v4610_v8 = vmul.f32 0.03125, %v4608_v45 }
0x1c50   : > { %v4612_v42 = vadd.f32 1e-05, %v4610_v8 }
0x1c52   : > { %5572 = vrsqrt.f32 %v4612_v42 }
0x1c5b   : > { %v5571_v53 = vpop.eup %5570 }
0x1c5c   : > { %v4615_v47 = vmul.f32 %v5571_v53, %v4599_v36 }
0x1c5e   : > { %v4623_v16 = vmul.f32 %v4957_v46, %v4615_v47 }
0x1c5f   : > { %v5573_v49 = vpop.eup %5572 }
0x1c60   : > { %v4631_v50 = vadd.f32 %v4958_v48, %v4623_v16  ;;  %v4616_v52 = vmul.f32 %v5573_v49, %v4600_v24 }
0x1c62   : > { %4633 = vst.msk [vmem:[#allocation7] sm:$0xff] %vm738_vm1, %v4631_v50  ;;  %v4624_v54 = vmul.f32 %v4957_v46, %v4616_v52 }
0x1c64   : > { %v4632_v55 = vadd.f32 %v4958_v48, %v4624_v54 }
0x1c66   : > { %4634 = vst.msk [vmem:[#allocation7 + $0x8] sm:$0xff] %vm738_vm1, %v4632_v55 }
0x1c67 PF: > { %p5448_p4 = scmp.eq.s32.totalorder %s5816_s25, 1  ;;  %s5710_s6 = smov [#allocation7]  }
0x1c68   : > { %s4641_s7 = sshll.u32 %s5710_s6, 4  ;;  %s4642_s7 = int_to_ptr.vmem [resolvable:$true] %s4641_s7 }
0x1c69   : > { %s5630_s29 = scalar_lea.vmem %s4642_s7, 256  ;;  %p5637_p0 = scmp.lt.s32.totalorder %s4642_s7, %s4642_s7 }
0x1c6a   : > { %p5631_p6 = scmp.ne.s32.totalorder %s4642_s7, %s5630_s29  ;;  %p5638_p9 = scmp.lt.s32.totalorder %s5630_s29, %s5630_s29 }
0x1c6c   : > { %p5632_p10 = pnand %p5631_p6, %p5448_p4  ;;  %p5639_p13 = por %p5638_p9, %p5637_p0 }
0x1c6e   : > { %p5633_p12 = pneg %p5632_p10 }
0x1c70   : > { %p5640_p2 = pnand %p5639_p13, %p5633_p12 }
0x1c72   : > { %5643 = shalt.err (!%p5640_p2)
}
0x1c73   : > { %s5711_s5 = smov 128   ;;  %s6669_s0 = sld [smem:[#allocation23_spill]] }
0x1c79   : > { %5437 = dma.vmem_to_hbm [thread:$0]  (%p5448_p4), %s4642_s7, 256, %s6669_s0, [#allocation4], %s5711_s5, %s5711_s5, %s5707_s22  }
0x1c7a   : > { %5679 = dma.done.wait (%p5448_p4), [#allocation4], 256  }
0x1c7b   : > { %5681 = vsyncadd (%p5448_p4), [#allocation4], 4294967040 }
0x1c7c PF: > { %s6670_s24 = sld [smem:[#allocation13_spill]] }
0x1c7d   : > { %s6671_s21 = sld [smem:[#allocation11_spill]] }
0x1c7e   : > { %s6672_s22 = sld [smem:[#allocation12_spill]] }
0x1c7f   : > { %s6673_s23 = sld [smem:[#allocation14_spill]] }
0x1c82   : > { %p30_p3 = scmp.ge.s32.totalorder %s6670_s24, 4  }
0x1c84   :  { %32 = sbr.rel (!%p30_p3) target bundleno = 16 (0x10), region = 182 }
0x1c89   :  { %4657 = vsyncpa [#allocation3], 1 }
0x1c8a   :  { %4659 = vsyncpa [#allocation3 + $0x1], 1 }
0x1c8b   :  { %4660 = vsyncpa [#allocation6], 1 }
0x1c8c   :  { %4662 = vsyncpa [#allocation6 + $0x1], 1 }
0x1c8d   :  { %4663 = vsyncpa [#allocation4], 1 }
0x1c8e   :  { %4665 = vsyncpa [#allocation4 + $0x1], 1 }

</bundles_post_ra>
